<compile_context>
chip_gen: v5e
topology: v5e:2x2
jax: 0.10.0
libtpu: 0.0.40
codegen_flags: <defaults>
</compile_context>

<pallas_src>
import jax
import jax.numpy as jnp
from jax import lax
from jax.experimental import pallas as pl
from jax.experimental.pallas import tpu as pltpu

EPS = 1e-5
_TILE_CANDIDATES = (8192, 4096, 2048, 1024, 512, 256, 128)


def _make_kernel(B, tb, n_tiles, CH, n_chunks):
    """B: true batch, tb: batch tile, CH: phase-2 lane chunk (divides n_tiles*tb)."""

    def kernel(x_ref, w1_ref, pk_ref, w2_ref, bn2_ref, o_ref, h_ref, sum_ref, ssq_ref):
        i = pl.program_id(0)

        @pl.when(i == 0)
        def _init():
            sum_ref[...] = jnp.zeros_like(sum_ref)
            ssq_ref[...] = jnp.zeros_like(ssq_ref)

        # ---------------- Phase 1: stream this batch tile ----------------
        # Linear1 on the MXU, transposed so the batch sits on the 128-lane axis:
        #   w1 (H, D) bf16  x  x (tb, D)->bf16  --contract D-->  hT (H, tb) f32
        b1 = pk_ref[:, 0:1]                                        # (H, 1)
        x_bf = x_ref[...].astype(jnp.bfloat16)                     # VPU cast, free slot
        hT = lax.dot_general(
            w1_ref[...], x_bf,
            dimension_numbers=(((1,), (1,)), ((), ())),
            preferred_element_type=jnp.float32,
        ) + b1                                                     # (H, tb)

        # Mask rows past the true batch (ragged tail tile) out of the *global*
        # BN1 statistics; masked before squaring so OOB padding never propagates.
        valid = B - i * tb
        lane_ids = lax.broadcasted_iota(jnp.int32, (1, tb), 1)
        hT_m = jnp.where(lane_ids < valid, hT, 0.0)
        sum_ref[...] += jnp.sum(hT_m, axis=1, keepdims=True)
        ssq_ref[...] += jnp.sum(hT_m * hT_m, axis=1, keepdims=True)

        off = pl.multiple_of(i * tb, tb)
        h_ref[:, pl.ds(off, tb)] = hT.astype(h_ref.dtype)          # resident bf16 acts

        # ------------- Phase 2: finish the network on the last step -------------
        @pl.when(i == n_tiles - 1)
        def _finish():
            inv_b = 1.0 / B                                        # static constant
            gamma1 = pk_ref[:, 1:2]                                # (H, 1)
            beta1 = pk_ref[:, 2:3]
            b2 = bn2_ref[0]

            # BatchNorm1d(H), training-mode stats, folded into one scale/shift FMA.
            mean1 = sum_ref[...] * inv_b
            var1 = ssq_ref[...] * inv_b - mean1 * mean1
            scale1 = gamma1 * lax.rsqrt(var1 + EPS)
            shift1 = beta1 - mean1 * scale1

            unroll = n_chunks <= 8

            # Pass A: BN1 -> ReLU -> Linear2 over lane chunks of h_ref (bounds
            # vreg pressure); the H->1 projection runs on the otherwise-idle MXU.
            # z lands lane-dense in o_ref; masked BN2 statistics accumulate.
            def chunk_a(c, carry):
                s, ss = carry
                o = pl.multiple_of(c * CH, CH)
                hc = h_ref[:, pl.ds(o, CH)].astype(jnp.float32)    # (H, CH)
                hc = jnp.maximum(hc * scale1 + shift1, 0.0)        # BN1 + ReLU, f32
                zc = lax.dot_general(                              # (1, H) x (H, CH)
                    w2_ref[...], hc,
                    dimension_numbers=(((1,), (0,)), ((), ())),
                    preferred_element_type=jnp.float32,
                ) + b2                                             # (1, CH)
                o_ref[:, pl.ds(o, CH)] = zc
                lm = (lax.broadcasted_iota(jnp.int32, (1, CH), 1) + o) < B
                zm = jnp.where(lm, zc, 0.0)
                return (s + jnp.sum(zm, keepdims=True),
                        ss + jnp.sum(zm * zm, keepdims=True))

            zero = jnp.zeros((1, 1), jnp.float32)
            zs, zss = lax.fori_loop(0, n_chunks, chunk_a, (zero, zero), unroll=unroll)

            # BatchNorm1d(1), training-mode stats over the true batch.
            mean2 = zs * inv_b
            var2 = zss * inv_b - mean2 * mean2
            scale2 = bn2_ref[1] * lax.rsqrt(var2 + EPS)
            shift2 = bn2_ref[2] - mean2 * scale2

            # Pass B: BN2 fold + sigmoid (exp + approx reciprocal -> EUP), in
            # place over the lane-dense output.  Kept f32 (v5e has no bf16 VPU/EUP).
            def chunk_b(c, carry):
                o = pl.multiple_of(c * CH, CH)
                zc = o_ref[:, pl.ds(o, CH)] * scale2 + shift2
                o_ref[:, pl.ds(o, CH)] = pl.reciprocal(1.0 + jnp.exp(-zc), approx=True)
                return carry

            lax.fori_loop(0, n_chunks, chunk_b, 0, unroll=unroll)

    return kernel


def _pick_batch_tile(batch, max_tile):
    """Largest lane-dense tile <= max_tile that minimizes cdiv padding."""
    if batch < 128:
        return batch                       # single full-dim tile (block == array dims)
    best_c, best_key = 128, None
    for c in _TILE_CANDIDATES:
        if c > max_tile or c > batch:
            continue
        key = (pl.cdiv(batch, c) * c, -c)  # minimize padded work, prefer bigger tile
        if best_key is None or key < best_key:
            best_c, best_key = c, key
    return best_c


def _pick_chunk(b_pad):
    for c in (2048, 1024, 512, 256, 128):
        if b_pad % c == 0:
            return c
    return b_pad                           # small batch: single chunk


def _vmem_limit_bytes(required):
    try:
        cap = int(pltpu.get_tpu_info().vmem_capacity_bytes)   # 64 MiB v7x, 128 v5e/v6e
    except Exception:
        cap = 64 << 20
    ceiling = int(cap * 0.78)              # headroom for Mosaic-internal scratch
    return int(min(max(32 << 20, required + (8 << 20)), ceiling))


def discriminator_forward(x, params, *, batch_tile=8192):
    """x: (B, input_dim) -> (B, 1) float32 (training-mode BatchNorm semantics)."""
    B, D = x.shape
    H, D_w = params["w1"].shape
    assert D == D_w, "input feature dim mismatch"
    if B < 2:
        # PyTorch's BatchNorm1d raises in train mode with a single sample.
        raise ValueError("Discriminator (training-mode BatchNorm) needs batch >= 2.")

    # Cap the streamed-x double buffer at ~24 MiB so big tiles fit every generation.
    x_itemsize = jnp.dtype(x.dtype).itemsize
    vmem_tb_cap = max(128, (24 << 20) // (2 * D * x_itemsize))
    tb = _pick_batch_tile(B, min(batch_tile, vmem_tb_cap))
    n_tiles = pl.cdiv(B, tb)
    b_pad = n_tiles * tb
    ch = _pick_chunk(b_pad)
    n_chunks = b_pad // ch

    # Only w1 (tiny, resident) is pre-cast; x streams in its original dtype and is
    # cast to bf16 on the VPU inside the kernel (saves a full HBM pass over x).
    w1m = params["w1"].astype(jnp.bfloat16)
    packed = jnp.stack(
        [params["b1"], params["gamma1"], params["beta1"]], axis=1
    ).astype(jnp.float32)                                           # (H, 3)
    w2_row = params["w2"].astype(jnp.float32).reshape(1, H)         # (1, H) for MXU dot
    bn2 = jnp.stack(
        [params["b2"], params["gamma2"], params["beta2"]]
    ).astype(jnp.float32)                                           # (3,)

    lane = lambda n: -(-n // 128) * 128
    sub = lambda n: -(-n // 8) * 8
    required = (
        2 * tb * lane(D) * x_itemsize      # double-buffered x tiles
        + 2 * sub(H) * lane(D) * 2         # w1 (bf16, resident)
        + 2 * sub(H) * lane(3) * 4         # b1/gamma1/beta1
        + 2 * sub(1) * lane(H) * 4         # w2 row
        + sub(H) * lane(b_pad) * 2         # resident bf16 hidden activations
        + 2 * sub(H) * lane(1) * 4         # BN1 sum / sumsq scratch
        + 2 * sub(1) * lane(b_pad) * 4     # lane-dense output block
    )
    # TODO(synk): batches whose (H, b_pad) bf16 block exceeds the per-generation
    # VMEM cap need an hT-spill path (async-copy bf16 hT tiles to HBM scratch in
    # phase 1, re-stream them in a second pass for BN1/ReLU/Linear2).
    # TODO(synk): on v7x, split the batch across the two TensorCores (per-core
    # partial sum/sumsq combined before phase 2) instead of the single
    # "arbitrary" grid axis below.

    kernel = _make_kernel(B, tb, n_tiles, ch, n_chunks)
    out = pl.pallas_call(
        kernel,
        out_shape=jax.ShapeDtypeStruct((1, b_pad), jnp.float32),
        grid=(n_tiles,),
        in_specs=[
            pl.BlockSpec((tb, D), lambda i: (i, 0)),               # x (streamed, f32)
            pl.BlockSpec((H, D), lambda i: (0, 0)),                # w1 (resident)
            pl.BlockSpec((H, 3), lambda i: (0, 0)),                # b1/gamma1/beta1
            pl.BlockSpec((1, H), lambda i: (0, 0)),                # w2 row (phase 2)
            pl.BlockSpec(memory_space=pltpu.MemorySpace.SMEM),     # b2/gamma2/beta2
        ],
        out_specs=pl.BlockSpec((1, b_pad), lambda i: (0, 0)),      # lane-dense output
        scratch_shapes=[
            pltpu.VMEM((H, b_pad), jnp.bfloat16),                  # resident hT (bf16)
            pltpu.VMEM((H, 1), jnp.float32),                       # BN1 running sum
            pltpu.VMEM((H, 1), jnp.float32),                       # BN1 running sumsq
        ],
        compiler_params=pltpu.CompilerParams(
            # The batch axis carries the global-BN reduction -> "arbitrary".
            dimension_semantics=("arbitrary",),
            vmem_limit_bytes=_vmem_limit_bytes(required),
        ),
    )(x, w1m, packed, w2_row, bn2)

    return out[0, :B].reshape(B, 1)


def init_params(key, input_dim=128, hidden_dim=32):
    """Deterministic synthetic init with PyTorch-native layouts (weight = (out, in))."""
    k1, k2, k3, k4 = jax.random.split(key, 4)
    bound1 = float(input_dim) ** -0.5
    bound2 = float(hidden_dim) ** -0.5
    return {
        "w1": jax.random.uniform(k1, (hidden_dim, input_dim), jnp.float32, -bound1, bound1),
        "b1": jax.random.uniform(k2, (hidden_dim,), jnp.float32, -bound1, bound1),
        "gamma1": jnp.ones((hidden_dim,), jnp.float32),
        "beta1": jnp.zeros((hidden_dim,), jnp.float32),
        "w2": jax.random.uniform(k3, (hidden_dim,), jnp.float32, -bound2, bound2),
        "b2": jax.random.uniform(k4, (), jnp.float32, -bound2, bound2),
        "gamma2": jnp.ones((), jnp.float32),
        "beta2": jnp.zeros((), jnp.float32),
    }


def _reference_forward(x, params):
    """Pure-JAX reference (same bf16 MXU inputs) for correctness checking."""
    xm = x.astype(jnp.bfloat16)
    w1 = params["w1"].astype(jnp.bfloat16)
    h = jnp.dot(xm, w1.T, preferred_element_type=jnp.float32) + params["b1"]
    m1 = jnp.mean(h, axis=0)
    v1 = jnp.mean(jnp.square(h - m1), axis=0)
    h = (h - m1) * lax.rsqrt(v1 + EPS) * params["gamma1"] + params["beta1"]
    h = jnp.maximum(h, 0.0)
    z = h @ params["w2"][:, None] + params["b2"]
    m2 = jnp.mean(z)
    v2 = jnp.mean(jnp.square(z - m2))
    z = (z - m2) * lax.rsqrt(v2 + EPS) * params["gamma2"] + params["beta2"]
    return jax.nn.sigmoid(z)


if __name__ == "__main__":
    key = jax.random.PRNGKey(0)
    kx1, kx2, kx3, kp = jax.random.split(key, 4)

    D, H = 128, 32
    params = init_params(kp, input_dim=D, hidden_dim=H)

    def check(x, **kw):
        out = jax.block_until_ready(discriminator_forward(x, params, **kw))
        ref = _reference_forward(x, params)
        assert out.shape == (x.shape[0], 1)
        assert bool(jnp.all(jnp.isfinite(out)))
        assert bool(jnp.all((out >= 0.0) & (out <= 1.0)))
        err = float(jnp.max(jnp.abs(out - ref)))
        assert err < 2e-2, err

    # Ragged batch: cdiv grid (3 x 128-row tiles) with a masked tail tile.
    check(jax.random.normal(kx1, (300, D), jnp.float32))
    # Exactly-tiled multi-tile pipelined path.
    check(jax.random.normal(kx2, (512, D), jnp.float32), batch_tile=128)
    # Small batch: single full-dim tile.
    check(jax.random.normal(kx3, (8, D), jnp.float32))

    print("KERNEL_OK")
</pallas_src>

<mosaic_0001>
module attributes {stable_mosaic.version = 11 : i64} {
  func.func @kernel(%arg0: i32, %arg1: memref<128x128xf32, #tpu.memory_space<vmem>>, %arg2: memref<32x128xbf16, #tpu.memory_space<vmem>>, %arg3: memref<32x3xf32, #tpu.memory_space<vmem>>, %arg4: memref<1x32xf32, #tpu.memory_space<vmem>>, %arg5: memref<3xf32, #tpu.memory_space<smem>>, %arg6: memref<1x384xf32, #tpu.memory_space<vmem>>, %arg7: memref<32x384xbf16, #tpu.memory_space<vmem>>, %arg8: memref<32x1xf32, #tpu.memory_space<vmem>>, %arg9: memref<32x1xf32, #tpu.memory_space<vmem>>) attributes {dimension_semantics = [#tpu.dimension_semantics<arbitrary>], iteration_bounds = array<i64: 3>, scalar_prefetch = 0 : i64, scratch_operands = 3 : i64, tpu.core_type = #tpu.core_type<tc>, window_params = [{transform_indices = @transform_0, window_bounds = array<i64: 128, 128>}, {pipeline_mode = #tpu.pipeline_mode<synchronous>, transform_indices = @transform_1, window_bounds = array<i64: 32, 128>}, {pipeline_mode = #tpu.pipeline_mode<synchronous>, transform_indices = @transform_2, window_bounds = array<i64: 32, 3>}, {pipeline_mode = #tpu.pipeline_mode<synchronous>, transform_indices = @transform_3, window_bounds = array<i64: 1, 32>}, {transform_indices = @transform_4, window_bounds = array<i64: 3>}, {pipeline_mode = #tpu.pipeline_mode<synchronous>, transform_indices = @transform_5, window_bounds = array<i64: 1, 384>}]} {
    %c0_i32 = arith.constant 0 : i32
    %0 = arith.cmpi eq, %arg0, %c0_i32 : i32
    %1 = arith.extui %0 : i1 to i32
    %c0_i32_0 = arith.constant 0 : i32
    %2 = arith.cmpi ne, %1, %c0_i32_0 : i32
    scf.if %2 {
      %cst_20 = arith.constant 0.000000e+00 : f32
      %38 = vector.broadcast %cst_20 : f32 to vector<32x1xf32>
      %c0_21 = arith.constant 0 : index
      %c0_22 = arith.constant 0 : index
      %39 = vector.load %arg8[%c0_21, %c0_22] : memref<32x1xf32, #tpu.memory_space<vmem>>, vector<32x1xf32>
      tpu.vector_store %arg8[%c0_21, %c0_22], %38 {strides = array<i32>} : memref<32x1xf32, #tpu.memory_space<vmem>>, vector<32x1xf32>,
      %cst_23 = arith.constant 0.000000e+00 : f32
      %40 = vector.broadcast %cst_23 : f32 to vector<32x1xf32>
      %c0_24 = arith.constant 0 : index
      %c0_25 = arith.constant 0 : index
      %41 = vector.load %arg9[%c0_24, %c0_25] : memref<32x1xf32, #tpu.memory_space<vmem>>, vector<32x1xf32>
      tpu.vector_store %arg9[%c0_24, %c0_25], %40 {strides = array<i32>} : memref<32x1xf32, #tpu.memory_space<vmem>>, vector<32x1xf32>,
    } else {
    }
    %c0 = arith.constant 0 : index
    %c0_1 = arith.constant 0 : index
    %3 = vector.load %arg3[%c0, %c0_1] : memref<32x3xf32, #tpu.memory_space<vmem>>, vector<32x1xf32>
    %c0_2 = arith.constant 0 : index
    %c0_3 = arith.constant 0 : index
    %4 = vector.load %arg1[%c0_2, %c0_3] : memref<128x128xf32, #tpu.memory_space<vmem>>, vector<128x128xf32>
    %5 = arith.truncf %4 : vector<128x128xf32> to vector<128x128xbf16>
    %c0_4 = arith.constant 0 : index
    %c0_5 = arith.constant 0 : index
    %6 = vector.load %arg2[%c0_4, %c0_5] : memref<32x128xbf16, #tpu.memory_space<vmem>>, vector<32x128xbf16>
    %cst = arith.constant dense<0.000000e+00> : vector<32x128xf32>
    %7 = tpu.matmul %6, %5, %cst {dimension_numbers = #tpu.dot_dimension_numbers<[1], [1], [0], [0], [0, 0, 1, 0], [], []>} : vector<32x128xbf16>, vector<128x128xbf16>, vector<32x128xf32> -> vector<32x128xf32>
    %8 = vector.broadcast %3 : vector<32x1xf32> to vector<32x128xf32>
    %9 = arith.addf %7, %8 : vector<32x128xf32>
    %c128_i32 = arith.constant 128 : i32
    %10 = arith.muli %arg0, %c128_i32 : i32
    %c300_i32 = arith.constant 300 : i32
    %11 = arith.subi %c300_i32, %10 : i32
    %12 = tpu.iota {dimensions = array<i32: 1>} : vector<1x128xi32>
    %13 = vector.broadcast %11 : i32 to vector<1x128xi32>
    %14 = arith.cmpi slt, %12, %13 : vector<1x128xi32>
    %cst_6 = arith.constant 0.000000e+00 : f32
    %15 = vector.shape_cast %14 : vector<1x128xi1> to vector<1x128xi1>
    %16 = vector.broadcast %15 : vector<1x128xi1> to vector<32x128xi1>
    %17 = vector.broadcast %cst_6 : f32 to vector<32x128xf32>
    %18 = arith.select %16, %9, %17 : vector<32x128xi1>, vector<32x128xf32>
    %c0_7 = arith.constant 0 : index
    %c0_8 = arith.constant 0 : index
    %19 = vector.load %arg8[%c0_7, %c0_8] : memref<32x1xf32, #tpu.memory_space<vmem>>, vector<32x1xf32>
    %cst_9 = arith.constant dense<0.000000e+00> : vector<32xf32>
    %20 = vector.multi_reduction <add>, %18, %cst_9 [1] : vector<32x128xf32> to vector<32xf32>
    %21 = vector.shape_cast %20 : vector<32xf32> to vector<32x1xf32>
    %22 = arith.addf %19, %21 : vector<32x1xf32>
    %c0_10 = arith.constant 0 : index
    %c0_11 = arith.constant 0 : index
    %23 = vector.load %arg8[%c0_10, %c0_11] : memref<32x1xf32, #tpu.memory_space<vmem>>, vector<32x1xf32>
    tpu.vector_store %arg8[%c0_10, %c0_11], %22 {strides = array<i32>} : memref<32x1xf32, #tpu.memory_space<vmem>>, vector<32x1xf32>,
    %c0_12 = arith.constant 0 : index
    %c0_13 = arith.constant 0 : index
    %24 = vector.load %arg9[%c0_12, %c0_13] : memref<32x1xf32, #tpu.memory_space<vmem>>, vector<32x1xf32>
    %25 = arith.mulf %18, %18 : vector<32x128xf32>
    %cst_14 = arith.constant dense<0.000000e+00> : vector<32xf32>
    %26 = vector.multi_reduction <add>, %25, %cst_14 [1] : vector<32x128xf32> to vector<32xf32>
    %27 = vector.shape_cast %26 : vector<32xf32> to vector<32x1xf32>
    %28 = arith.addf %24, %27 : vector<32x1xf32>
    %c0_15 = arith.constant 0 : index
    %c0_16 = arith.constant 0 : index
    %29 = vector.load %arg9[%c0_15, %c0_16] : memref<32x1xf32, #tpu.memory_space<vmem>>, vector<32x1xf32>
    tpu.vector_store %arg9[%c0_15, %c0_16], %28 {strides = array<i32>} : memref<32x1xf32, #tpu.memory_space<vmem>>, vector<32x1xf32>,
    %c128_i32_17 = arith.constant 128 : i32
    %30 = arith.muli %arg0, %c128_i32_17 : i32
    %31 = tpu.assume_multiple %30, 128 : i32
    %32 = arith.truncf %9 : vector<32x128xf32> to vector<32x128xbf16>
    %c0_18 = arith.constant 0 : index
    %33 = arith.index_cast %31 : i32 to index
    %34 = vector.load %arg7[%c0_18, %33] : memref<32x384xbf16, #tpu.memory_space<vmem>>, vector<32x128xbf16>
    tpu.vector_store %arg7[%c0_18, %33], %32 {strides = array<i32>} : memref<32x384xbf16, #tpu.memory_space<vmem>>, vector<32x128xbf16>,
    %c2_i32 = arith.constant 2 : i32
    %35 = arith.cmpi eq, %arg0, %c2_i32 : i32
    %36 = arith.extui %35 : i1 to i32
    %c0_i32_19 = arith.constant 0 : i32
    %37 = arith.cmpi ne, %36, %c0_i32_19 : i32
    scf.if %37 {
      %c0_20 = arith.constant 0 : index
      %c1 = arith.constant 1 : index
      %38 = vector.load %arg3[%c0_20, %c1] : memref<32x3xf32, #tpu.memory_space<vmem>>, vector<32x1xf32>
      %c0_21 = arith.constant 0 : index
      %c2 = arith.constant 2 : index
      %39 = vector.load %arg3[%c0_21, %c2] : memref<32x3xf32, #tpu.memory_space<vmem>>, vector<32x1xf32>
      %c0_22 = arith.constant 0 : index
      %40 = memref.load %arg5[%c0_22] : memref<3xf32, #tpu.memory_space<smem>>
      %c0_23 = arith.constant 0 : index
      %c0_24 = arith.constant 0 : index
      %41 = vector.load %arg8[%c0_23, %c0_24] : memref<32x1xf32, #tpu.memory_space<vmem>>, vector<32x1xf32>
      %cst_25 = arith.constant 0.00333333341 : f32
      %42 = vector.broadcast %cst_25 : f32 to vector<32x1xf32>
      %43 = arith.mulf %41, %42 : vector<32x1xf32>
      %c0_26 = arith.constant 0 : index
      %c0_27 = arith.constant 0 : index
      %44 = vector.load %arg9[%c0_26, %c0_27] : memref<32x1xf32, #tpu.memory_space<vmem>>, vector<32x1xf32>
      %cst_28 = arith.constant 0.00333333341 : f32
      %45 = vector.broadcast %cst_28 : f32 to vector<32x1xf32>
      %46 = arith.mulf %44, %45 : vector<32x1xf32>
      %47 = arith.mulf %43, %43 : vector<32x1xf32>
      %48 = arith.subf %46, %47 : vector<32x1xf32>
      %cst_29 = arith.constant 9.99999974E-6 : f32
      %49 = vector.broadcast %cst_29 : f32 to vector<32x1xf32>
      %50 = arith.addf %48, %49 : vector<32x1xf32>
      %51 = math.rsqrt %50 : vector<32x1xf32>
      %52 = arith.mulf %38, %51 : vector<32x1xf32>
      %53 = arith.mulf %43, %52 : vector<32x1xf32>
      %54 = arith.subf %39, %53 : vector<32x1xf32>
      %cst_30 = arith.constant 0.000000e+00 : f32
      %55 = vector.broadcast %cst_30 : f32 to vector<1x1xf32>
      %c0_i32_31 = arith.constant 0 : i32
      %c128_i32_32 = arith.constant 128 : i32
      %56 = arith.muli %c0_i32_31, %c128_i32_32 : i32
      %57 = tpu.assume_multiple %56, 128 : i32
      %c0_33 = arith.constant 0 : index
      %58 = arith.index_cast %57 : i32 to index
      %59 = vector.load %arg7[%c0_33, %58] : memref<32x384xbf16, #tpu.memory_space<vmem>>, vector<32x128xbf16>
      %60 = arith.extf %59 : vector<32x128xbf16> to vector<32x128xf32>
      %61 = vector.broadcast %52 : vector<32x1xf32> to vector<32x128xf32>
      %62 = arith.mulf %60, %61 : vector<32x128xf32>
      %63 = vector.broadcast %54 : vector<32x1xf32> to vector<32x128xf32>
      %64 = arith.addf %62, %63 : vector<32x128xf32>
      %cst_34 = arith.constant 0.000000e+00 : f32
      %65 = vector.broadcast %cst_34 : f32 to vector<32x128xf32>
      %66 = arith.maximumf %64, %65 : vector<32x128xf32>
      %c0_35 = arith.constant 0 : index
      %c0_36 = arith.constant 0 : index
      %67 = vector.load %arg4[%c0_35, %c0_36] : memref<1x32xf32, #tpu.memory_space<vmem>>, vector<1x32xf32>
      %cst_37 = arith.constant dense<0.000000e+00> : vector<1x128xf32>
      %68 = tpu.matmul %67, %66, %cst_37 {dimension_numbers = #tpu.dot_dimension_numbers<[1], [0], [0], [1], [0, 0, 1, 1], [], []>} : vector<1x32xf32>, vector<32x128xf32>, vector<1x128xf32> -> vector<1x128xf32>
      %69 = vector.broadcast %40 : f32 to vector<1x128xf32>
      %70 = arith.addf %68, %69 : vector<1x128xf32>
      %c0_38 = arith.constant 0 : index
      %71 = arith.index_cast %57 : i32 to index
      %72 = vector.load %arg6[%c0_38, %71] : memref<1x384xf32, #tpu.memory_space<vmem>>, vector<1x128xf32>
      tpu.vector_store %arg6[%c0_38, %71], %70 {strides = array<i32>} : memref<1x384xf32, #tpu.memory_space<vmem>>, vector<1x128xf32>,
      %73 = tpu.iota {dimensions = array<i32: 1>} : vector<1x128xi32>
      %74 = vector.broadcast %57 : i32 to vector<1x128xi32>
      %75 = arith.addi %73, %74 : vector<1x128xi32>
      %c300_i32_39 = arith.constant 300 : i32
      %76 = vector.broadcast %c300_i32_39 : i32 to vector<1x128xi32>
      %77 = arith.cmpi slt, %75, %76 : vector<1x128xi32>
      %cst_40 = arith.constant 0.000000e+00 : f32
      %78 = vector.broadcast %cst_40 : f32 to vector<1x128xf32>
      %79 = arith.select %77, %70, %78 : vector<1x128xi1>, vector<1x128xf32>
      %80 = vector.shape_cast %79 : vector<1x128xf32> to vector<1x1x128xf32>
      %cst_41 = arith.constant dense<0.000000e+00> : vector<1xf32>
      %81 = vector.multi_reduction <add>, %80, %cst_41 [1, 2] : vector<1x1x128xf32> to vector<1xf32>
      %82 = vector.shape_cast %81 : vector<1xf32> to vector<1x1x1xf32>
      %83 = vector.extract %82[0, 0, 0] : f32 from vector<1x1x1xf32>
      %84 = vector.broadcast %83 : f32 to vector<1x1xf32>
      %85 = arith.addf %55, %84 : vector<1x1xf32>
      %86 = arith.mulf %79, %79 : vector<1x128xf32>
      %87 = vector.shape_cast %86 : vector<1x128xf32> to vector<1x1x128xf32>
      %cst_42 = arith.constant dense<0.000000e+00> : vector<1xf32>
      %88 = vector.multi_reduction <add>, %87, %cst_42 [1, 2] : vector<1x1x128xf32> to vector<1xf32>
      %89 = vector.shape_cast %88 : vector<1xf32> to vector<1x1x1xf32>
      %90 = vector.extract %89[0, 0, 0] : f32 from vector<1x1x1xf32>
      %91 = vector.broadcast %90 : f32 to vector<1x1xf32>
      %92 = arith.addf %55, %91 : vector<1x1xf32>
      %c1_i32 = arith.constant 1 : i32
      %c128_i32_43 = arith.constant 128 : i32
      %93 = arith.muli %c1_i32, %c128_i32_43 : i32
      %94 = tpu.assume_multiple %93, 128 : i32
      %c0_44 = arith.constant 0 : index
      %95 = arith.index_cast %94 : i32 to index
      %96 = vector.load %arg7[%c0_44, %95] : memref<32x384xbf16, #tpu.memory_space<vmem>>, vector<32x128xbf16>
      %97 = arith.extf %96 : vector<32x128xbf16> to vector<32x128xf32>
      %98 = vector.broadcast %52 : vector<32x1xf32> to vector<32x128xf32>
      %99 = arith.mulf %97, %98 : vector<32x128xf32>
      %100 = vector.broadcast %54 : vector<32x1xf32> to vector<32x128xf32>
      %101 = arith.addf %99, %100 : vector<32x128xf32>
      %cst_45 = arith.constant 0.000000e+00 : f32
      %102 = vector.broadcast %cst_45 : f32 to vector<32x128xf32>
      %103 = arith.maximumf %101, %102 : vector<32x128xf32>
      %c0_46 = arith.constant 0 : index
      %c0_47 = arith.constant 0 : index
      %104 = vector.load %arg4[%c0_46, %c0_47] : memref<1x32xf32, #tpu.memory_space<vmem>>, vector<1x32xf32>
      %cst_48 = arith.constant dense<0.000000e+00> : vector<1x128xf32>
      %105 = tpu.matmul %104, %103, %cst_48 {dimension_numbers = #tpu.dot_dimension_numbers<[1], [0], [0], [1], [0, 0, 1, 1], [], []>} : vector<1x32xf32>, vector<32x128xf32>, vector<1x128xf32> -> vector<1x128xf32>
      %106 = vector.broadcast %40 : f32 to vector<1x128xf32>
      %107 = arith.addf %105, %106 : vector<1x128xf32>
      %c0_49 = arith.constant 0 : index
      %108 = arith.index_cast %94 : i32 to index
      %109 = vector.load %arg6[%c0_49, %108] : memref<1x384xf32, #tpu.memory_space<vmem>>, vector<1x128xf32>
      tpu.vector_store %arg6[%c0_49, %108], %107 {strides = array<i32>} : memref<1x384xf32, #tpu.memory_space<vmem>>, vector<1x128xf32>,
      %110 = tpu.iota {dimensions = array<i32: 1>} : vector<1x128xi32>
      %111 = vector.broadcast %94 : i32 to vector<1x128xi32>
      %112 = arith.addi %110, %111 : vector<1x128xi32>
      %c300_i32_50 = arith.constant 300 : i32
      %113 = vector.broadcast %c300_i32_50 : i32 to vector<1x128xi32>
      %114 = arith.cmpi slt, %112, %113 : vector<1x128xi32>
      %cst_51 = arith.constant 0.000000e+00 : f32
      %115 = vector.broadcast %cst_51 : f32 to vector<1x128xf32>
      %116 = arith.select %114, %107, %115 : vector<1x128xi1>, vector<1x128xf32>
      %117 = vector.shape_cast %116 : vector<1x128xf32> to vector<1x1x128xf32>
      %cst_52 = arith.constant dense<0.000000e+00> : vector<1xf32>
      %118 = vector.multi_reduction <add>, %117, %cst_52 [1, 2] : vector<1x1x128xf32> to vector<1xf32>
      %119 = vector.shape_cast %118 : vector<1xf32> to vector<1x1x1xf32>
      %120 = vector.extract %119[0, 0, 0] : f32 from vector<1x1x1xf32>
      %121 = vector.broadcast %120 : f32 to vector<1x1xf32>
      %122 = arith.addf %85, %121 : vector<1x1xf32>
      %123 = arith.mulf %116, %116 : vector<1x128xf32>
      %124 = vector.shape_cast %123 : vector<1x128xf32> to vector<1x1x128xf32>
      %cst_53 = arith.constant dense<0.000000e+00> : vector<1xf32>
      %125 = vector.multi_reduction <add>, %124, %cst_53 [1, 2] : vector<1x1x128xf32> to vector<1xf32>
      %126 = vector.shape_cast %125 : vector<1xf32> to vector<1x1x1xf32>
      %127 = vector.extract %126[0, 0, 0] : f32 from vector<1x1x1xf32>
      %128 = vector.broadcast %127 : f32 to vector<1x1xf32>
      %129 = arith.addf %92, %128 : vector<1x1xf32>
      %c2_i32_54 = arith.constant 2 : i32
      %c128_i32_55 = arith.constant 128 : i32
      %130 = arith.muli %c2_i32_54, %c128_i32_55 : i32
      %131 = tpu.assume_multiple %130, 128 : i32
      %c0_56 = arith.constant 0 : index
      %132 = arith.index_cast %131 : i32 to index
      %133 = vector.load %arg7[%c0_56, %132] : memref<32x384xbf16, #tpu.memory_space<vmem>>, vector<32x128xbf16>
      %134 = arith.extf %133 : vector<32x128xbf16> to vector<32x128xf32>
      %135 = vector.broadcast %52 : vector<32x1xf32> to vector<32x128xf32>
      %136 = arith.mulf %134, %135 : vector<32x128xf32>
      %137 = vector.broadcast %54 : vector<32x1xf32> to vector<32x128xf32>
      %138 = arith.addf %136, %137 : vector<32x128xf32>
      %cst_57 = arith.constant 0.000000e+00 : f32
      %139 = vector.broadcast %cst_57 : f32 to vector<32x128xf32>
      %140 = arith.maximumf %138, %139 : vector<32x128xf32>
      %c0_58 = arith.constant 0 : index
      %c0_59 = arith.constant 0 : index
      %141 = vector.load %arg4[%c0_58, %c0_59] : memref<1x32xf32, #tpu.memory_space<vmem>>, vector<1x32xf32>
      %cst_60 = arith.constant dense<0.000000e+00> : vector<1x128xf32>
      %142 = tpu.matmul %141, %140, %cst_60 {dimension_numbers = #tpu.dot_dimension_numbers<[1], [0], [0], [1], [0, 0, 1, 1], [], []>} : vector<1x32xf32>, vector<32x128xf32>, vector<1x128xf32> -> vector<1x128xf32>
      %143 = vector.broadcast %40 : f32 to vector<1x128xf32>
      %144 = arith.addf %142, %143 : vector<1x128xf32>
      %c0_61 = arith.constant 0 : index
      %145 = arith.index_cast %131 : i32 to index
      %146 = vector.load %arg6[%c0_61, %145] : memref<1x384xf32, #tpu.memory_space<vmem>>, vector<1x128xf32>
      tpu.vector_store %arg6[%c0_61, %145], %144 {strides = array<i32>} : memref<1x384xf32, #tpu.memory_space<vmem>>, vector<1x128xf32>,
      %147 = tpu.iota {dimensions = array<i32: 1>} : vector<1x128xi32>
      %148 = vector.broadcast %131 : i32 to vector<1x128xi32>
      %149 = arith.addi %147, %148 : vector<1x128xi32>
      %c300_i32_62 = arith.constant 300 : i32
      %150 = vector.broadcast %c300_i32_62 : i32 to vector<1x128xi32>
      %151 = arith.cmpi slt, %149, %150 : vector<1x128xi32>
      %cst_63 = arith.constant 0.000000e+00 : f32
      %152 = vector.broadcast %cst_63 : f32 to vector<1x128xf32>
      %153 = arith.select %151, %144, %152 : vector<1x128xi1>, vector<1x128xf32>
      %154 = vector.shape_cast %153 : vector<1x128xf32> to vector<1x1x128xf32>
      %cst_64 = arith.constant dense<0.000000e+00> : vector<1xf32>
      %155 = vector.multi_reduction <add>, %154, %cst_64 [1, 2] : vector<1x1x128xf32> to vector<1xf32>
      %156 = vector.shape_cast %155 : vector<1xf32> to vector<1x1x1xf32>
      %157 = vector.extract %156[0, 0, 0] : f32 from vector<1x1x1xf32>
      %158 = vector.broadcast %157 : f32 to vector<1x1xf32>
      %159 = arith.addf %122, %158 : vector<1x1xf32>
      %160 = arith.mulf %153, %153 : vector<1x128xf32>
      %161 = vector.shape_cast %160 : vector<1x128xf32> to vector<1x1x128xf32>
      %cst_65 = arith.constant dense<0.000000e+00> : vector<1xf32>
      %162 = vector.multi_reduction <add>, %161, %cst_65 [1, 2] : vector<1x1x128xf32> to vector<1xf32>
      %163 = vector.shape_cast %162 : vector<1xf32> to vector<1x1x1xf32>
      %164 = vector.extract %163[0, 0, 0] : f32 from vector<1x1x1xf32>
      %165 = vector.broadcast %164 : f32 to vector<1x1xf32>
      %166 = arith.addf %129, %165 : vector<1x1xf32>
      %c3_i32 = arith.constant 3 : i32
      %cst_66 = arith.constant 0.00333333341 : f32
      %167 = vector.broadcast %cst_66 : f32 to vector<1x1xf32>
      %168 = arith.mulf %159, %167 : vector<1x1xf32>
      %cst_67 = arith.constant 0.00333333341 : f32
      %169 = vector.broadcast %cst_67 : f32 to vector<1x1xf32>
      %170 = arith.mulf %166, %169 : vector<1x1xf32>
      %171 = arith.mulf %168, %168 : vector<1x1xf32>
      %172 = arith.subf %170, %171 : vector<1x1xf32>
      %c1_68 = arith.constant 1 : index
      %173 = memref.load %arg5[%c1_68] : memref<3xf32, #tpu.memory_space<smem>>
      %cst_69 = arith.constant 9.99999974E-6 : f32
      %174 = vector.broadcast %cst_69 : f32 to vector<1x1xf32>
      %175 = arith.addf %172, %174 : vector<1x1xf32>
      %176 = math.rsqrt %175 : vector<1x1xf32>
      %177 = vector.broadcast %173 : f32 to vector<1x1xf32>
      %178 = arith.mulf %177, %176 : vector<1x1xf32>
      %c2_70 = arith.constant 2 : index
      %179 = memref.load %arg5[%c2_70] : memref<3xf32, #tpu.memory_space<smem>>
      %180 = arith.mulf %168, %178 : vector<1x1xf32>
      %181 = vector.broadcast %179 : f32 to vector<1x1xf32>
      %182 = arith.subf %181, %180 : vector<1x1xf32>
      %c0_i32_71 = arith.constant 0 : i32
      %c128_i32_72 = arith.constant 128 : i32
      %183 = arith.muli %c0_i32_71, %c128_i32_72 : i32
      %184 = tpu.assume_multiple %183, 128 : i32
      %c0_73 = arith.constant 0 : index
      %185 = arith.index_cast %184 : i32 to index
      %186 = vector.load %arg6[%c0_73, %185] : memref<1x384xf32, #tpu.memory_space<vmem>>, vector<1x128xf32>
      %187 = vector.broadcast %178 : vector<1x1xf32> to vector<1x128xf32>
      %188 = arith.mulf %186, %187 : vector<1x128xf32>
      %189 = vector.broadcast %182 : vector<1x1xf32> to vector<1x128xf32>
      %190 = arith.addf %188, %189 : vector<1x128xf32>
      %cst_74 = arith.constant 0.000000e+00 : f32
      %191 = vector.broadcast %cst_74 : f32 to vector<1x128xf32>
      %192 = arith.subf %191, %190 : vector<1x128xf32>
      %193 = math.exp %192 : vector<1x128xf32>
      %cst_75 = arith.constant 1.000000e+00 : f32
      %194 = vector.broadcast %cst_75 : f32 to vector<1x128xf32>
      %195 = arith.addf %194, %193 : vector<1x128xf32>
      %196 = tpu.reciprocal %195 {approx = true} : vector<1x128xf32> -> vector<1x128xf32>
      %c0_76 = arith.constant 0 : index
      %197 = arith.index_cast %184 : i32 to index
      %198 = vector.load %arg6[%c0_76, %197] : memref<1x384xf32, #tpu.memory_space<vmem>>, vector<1x128xf32>
      tpu.vector_store %arg6[%c0_76, %197], %196 {strides = array<i32>} : memref<1x384xf32, #tpu.memory_space<vmem>>, vector<1x128xf32>,
      %c1_i32_77 = arith.constant 1 : i32
      %c128_i32_78 = arith.constant 128 : i32
      %199 = arith.muli %c1_i32_77, %c128_i32_78 : i32
      %200 = tpu.assume_multiple %199, 128 : i32
      %c0_79 = arith.constant 0 : index
      %201 = arith.index_cast %200 : i32 to index
      %202 = vector.load %arg6[%c0_79, %201] : memref<1x384xf32, #tpu.memory_space<vmem>>, vector<1x128xf32>
      %203 = vector.broadcast %178 : vector<1x1xf32> to vector<1x128xf32>
      %204 = arith.mulf %202, %203 : vector<1x128xf32>
      %205 = vector.broadcast %182 : vector<1x1xf32> to vector<1x128xf32>
      %206 = arith.addf %204, %205 : vector<1x128xf32>
      %cst_80 = arith.constant 0.000000e+00 : f32
      %207 = vector.broadcast %cst_80 : f32 to vector<1x128xf32>
      %208 = arith.subf %207, %206 : vector<1x128xf32>
      %209 = math.exp %208 : vector<1x128xf32>
      %cst_81 = arith.constant 1.000000e+00 : f32
      %210 = vector.broadcast %cst_81 : f32 to vector<1x128xf32>
      %211 = arith.addf %210, %209 : vector<1x128xf32>
      %212 = tpu.reciprocal %211 {approx = true} : vector<1x128xf32> -> vector<1x128xf32>
      %c0_82 = arith.constant 0 : index
      %213 = arith.index_cast %200 : i32 to index
      %214 = vector.load %arg6[%c0_82, %213] : memref<1x384xf32, #tpu.memory_space<vmem>>, vector<1x128xf32>
      tpu.vector_store %arg6[%c0_82, %213], %212 {strides = array<i32>} : memref<1x384xf32, #tpu.memory_space<vmem>>, vector<1x128xf32>,
      %c2_i32_83 = arith.constant 2 : i32
      %c128_i32_84 = arith.constant 128 : i32
      %215 = arith.muli %c2_i32_83, %c128_i32_84 : i32
      %216 = tpu.assume_multiple %215, 128 : i32
      %c0_85 = arith.constant 0 : index
      %217 = arith.index_cast %216 : i32 to index
      %218 = vector.load %arg6[%c0_85, %217] : memref<1x384xf32, #tpu.memory_space<vmem>>, vector<1x128xf32>
      %219 = vector.broadcast %178 : vector<1x1xf32> to vector<1x128xf32>
      %220 = arith.mulf %218, %219 : vector<1x128xf32>
      %221 = vector.broadcast %182 : vector<1x1xf32> to vector<1x128xf32>
      %222 = arith.addf %220, %221 : vector<1x128xf32>
      %cst_86 = arith.constant 0.000000e+00 : f32
      %223 = vector.broadcast %cst_86 : f32 to vector<1x128xf32>
      %224 = arith.subf %223, %222 : vector<1x128xf32>
      %225 = math.exp %224 : vector<1x128xf32>
      %cst_87 = arith.constant 1.000000e+00 : f32
      %226 = vector.broadcast %cst_87 : f32 to vector<1x128xf32>
      %227 = arith.addf %226, %225 : vector<1x128xf32>
      %228 = tpu.reciprocal %227 {approx = true} : vector<1x128xf32> -> vector<1x128xf32>
      %c0_88 = arith.constant 0 : index
      %229 = arith.index_cast %216 : i32 to index
      %230 = vector.load %arg6[%c0_88, %229] : memref<1x384xf32, #tpu.memory_space<vmem>>, vector<1x128xf32>
      tpu.vector_store %arg6[%c0_88, %229], %228 {strides = array<i32>} : memref<1x384xf32, #tpu.memory_space<vmem>>, vector<1x128xf32>,
      %c3_i32_89 = arith.constant 3 : i32
    } else {
    }
    return
  }
  func.func @transform_0(%arg0: i32) -> (i32, i32) {
    %c0_i32 = arith.constant 0 : i32
    %c0_i32_0 = arith.constant 0 : i32
    return %arg0, %c0_i32 : i32, i32
  }
  func.func @transform_1(%arg0: i32) -> (i32, i32) {
    %c0_i32 = arith.constant 0 : i32
    %c0_i32_0 = arith.constant 0 : i32
    %c0_i32_1 = arith.constant 0 : i32
    return %c0_i32, %c0_i32_0 : i32, i32
  }
  func.func @transform_2(%arg0: i32) -> (i32, i32) {
    %c0_i32 = arith.constant 0 : i32
    %c0_i32_0 = arith.constant 0 : i32
    %c0_i32_1 = arith.constant 0 : i32
    return %c0_i32, %c0_i32_0 : i32, i32
  }
  func.func @transform_3(%arg0: i32) -> (i32, i32) {
    %c0_i32 = arith.constant 0 : i32
    %c0_i32_0 = arith.constant 0 : i32
    %c0_i32_1 = arith.constant 0 : i32
    return %c0_i32, %c0_i32_0 : i32, i32
  }
  func.func @transform_4(%arg0: i32) -> i32 {
    %c0_i32 = arith.constant 0 : i32
    %c0_i32_0 = arith.constant 0 : i32
    return %c0_i32 : i32
  }
  func.func @transform_5(%arg0: i32) -> (i32, i32) {
    %c0_i32 = arith.constant 0 : i32
    %c0_i32_0 = arith.constant 0 : i32
    %c0_i32_1 = arith.constant 0 : i32
    return %c0_i32, %c0_i32_0 : i32, i32
  }
}

</mosaic_0001>

<bundles_post_ra>
// kernel: tpu_custom_call.1
= control target key start
LH: loop header
LB: loop body
LE: loop exit
PB: predicated region body
PF: predicated region fallthrough
CT: control target
= control target key end

     0   :  { %10 = vsyncpa [#allocation6], 0  ;;  %s1531_s0 = inlined_call_operand.hbm [shape: f32[300,128], index: 0, kind: input, shape index: {}]   ;;  %s1532_s1 = inlined_call_operand.vmem [shape: bf16[32,128], index: 1, kind: input, shape index: {}]   ;;  %s1533_s2 = inlined_call_operand.vmem [shape: f32[32,3], index: 2, kind: input, shape index: {}]   ;;  %s1534_s3 = inlined_call_operand.vmem [shape: f32[1,32], index: 3, kind: input, shape index: {}]   ;;  %s1535_s4 = inlined_call_operand.vmem [shape: f32[3], index: 4, kind: input, shape index: {}]   ;;  %s1536_s5 = inlined_call_operand.hbm [shape: f32[1,384], index: 5, kind: output, shape index: {}]  }
   0x1   :  { %12 = vsyncpa [#allocation6 + $0x1], 0 }
   0x2   :  { %13 = vsyncpa [#allocation8], 0 }
   0x3   :  { %14 = vsyncpa [#allocation7], 0  ;;  %s1267_s18 = smov 0   ;;  %s1269_s19 = smov 0  }
   0x4   :  { %s1271_s20 = smov 0   ;;  %s1273_s21 = smov 0  }
   0x5 LB: > { %s1286_s22 = sadd.s32 4294967295, %s1223_s21   ;;  %s1289_s23 = sadd.s32 1, %s1223_s21   ;;  %s1223_s21 = sphi %s1273_s21, %s1549_s21   ;;  %s1219_s20 = sphi %s1271_s20, %s1548_s20   ;;  %s1215_s19 = sphi %s1269_s19, %s1547_s19   ;;  %s1211_s18 = sphi %s1267_s18, %s1546_s18  }
   0x6   : > { %s24_s24 = ssub.s32 %s1223_s21, %s1289_s23  ;;  %s27_s25 = sadd.s32 1, %s1219_s20 }
   0x7   : > { %p25_p0 = scmp.eq.s32.totalorder %s24_s24, 0  ;;  %p34_p1 = scmp.ne.s32.totalorder %s1219_s20, %s1215_s19 }
   0x8   : > { %p35_p2 = scmp.eq.s32.totalorder %s1223_s21, 0  ;;  %p40_p3 = scmp.ne.s32.totalorder %s1215_s19, %s1211_s18 }
   0x9   : > { %s1299_s26 = scalar_select %p25_p0, %s1219_s20, %s27_s25  }
   0xa   : > { %p1301_p4 = por %p35_p2, %p34_p1  ;;  %p41_p5 = scmp.eq.s32.totalorder %s1286_s22, 0 }
   0xb   : > { %p953_p6 = scmp.ge.s32.totalorder %s1223_s21, 1  ;;  %p156_p7 = scmp.lt.s32.totalorder %s1223_s21, 4 }
   0xc   : > { %p1310_p8 = por %p41_p5, %p40_p3  ;;  %s177_s7 = sshll.u32 %s1535_s4, 4  ;;  %s178_s7 = int_to_ptr.vmem [resolvable:$true] %s177_s7 }
   0xd   : > { %p1315_p10 = pnand %p953_p6, %p156_p7  ;;  %s1225_s8 = smov [#allocation9]  }
   0xe   : > { %p955_p13 = scmp.ge.s32.totalorder %s1223_s21, 3 }
   0xf   : > { %p1019_p11 = pneg %p1315_p10 }
  0x10   : > { %184 = sbr.rel (%p955_p13) target bundleno = 57 (0x39), region = 32 }
  0x11   : > { %p1020_p12 = pnand %p1019_p11, %p41_p5 }
  0x13   : > { %1022 = dma.vmem_to_smem (!%p1020_p12), %s178_s7, 16, %s1225_s8, [#allocation8]  }
  0x15   : > { %187 = sbr.rel (!%p1301_p4) target bundleno = 57 (0x39), region = 36  ;;  %s188_s9 = sand.u32 (%p1301_p4), 1, %s1219_s20  }
  0x16   : > { %s957_s10 = sshll.u32 (%p1301_p4), %s1223_s21, 4  ;;  %s956_s11 = sshll.u32 (%p1301_p4), %s188_s9, 7 }
  0x17   : > { %s194_s12 = ssub.s32 (%p1301_p4), 38, %s957_s10  ;;  %s1334_s16 = scalar_lea.sflag (%p1301_p4), [#allocation6], %s188_s9 }
  0x18   : > { %p195_p0 = scmp.lt.s32.totalorder (%p1301_p4), %s194_s12, 16  ;;  %s192_s17 = scalar_lea.vmem (%p1301_p4), [#allocation5], %s956_s11 }
  0x1a   : > { %s1551_s12 = smov (!%p195_p0, %s194_s12), 16 }
  0x1b   : > { %s958_s13 = sshll.u32 %s1551_s12, 3 }
  0x1c   : > { %s198_s14 = ssub.s32 128, %s958_s13 }
  0x1d   : > { %s199_s15 = sshll.u32 %s198_s14, 4 }
  0x1e   : > { %200 = vsyncadd %s1334_s16, %s199_s15  ;;  %p1337_p1 = scmp.ne.s32.totalorder %s958_s13, 0  ;;  %s987_s24 = sshll.u32 %s1223_s21, 7 }
  0x1f   : > { %s203_s30 = scalar_lea.hbm %s1531_s0, %s987_s24  ;;  %s1345_s6 = sshll.u32 %s192_s17, 4  ;;  %s208_s6 = int_to_ptr.vmem [resolvable:$true] %s1345_s6 }
  0x20   : > { %s205_s7 = sshll.u32 %s203_s30, 4  ;;  %s962_s8 = sshll.u32 %s1551_s12, 7  ;;  %s1348_s7 = int_to_ptr.hbm [resolvable:$true] %s205_s7 }
  0x21   : > { %s1114_s9 = sshra.s32 %s1348_s7, 4  ;;  %s1116_s10 = sshrl.u32 %s962_s8, 4  ;;  %s1115_s9 = int_to_ptr.hbm [resolvable:$true] %s1114_s9 }
  0x22   : > { %s1121_s11 = scalar_lea.hbm %s1115_s9, %s1116_s10  ;;  %s1125_s14 = scalar_lea.hbm %s1531_s0, 304 }
  0x23   : > { %p1122_p2 = scmp.ne.s32.totalorder %s1115_s9, %s1121_s11  ;;  %p1126_p6 = scmp.lt.s32.totalorder %s1115_s9, %s1531_s0 }
  0x24   : > { %p1127_p7 = scmp.lt.s32.totalorder %s1125_s14, %s1121_s11 }
  0x25   : > { %p1123_p3 = pnand %p1122_p2, %p1337_p1 }
  0x26   : > { %p1128_p11 = por %p1127_p7, %p1126_p6 }
  0x27   : > { %p1124_p4 = pneg %p1123_p3 }
  0x29   : > { %p1129_p12 = pnand %p1128_p11, %p1124_p4 }
  0x2b   : > { %1132 = shalt.err (!%p1129_p12)
}
  0x2c   : > { %s1133_s24 = sshra.s32 %s208_s6, 4  ;;  %s1226_s27 = smov [#allocation5]   ;;  %s1134_s24 = int_to_ptr.vmem [resolvable:$true] %s1133_s24 }
  0x2d   : > { %s1140_s25 = scalar_lea.vmem %s1134_s24, %s1116_s10  ;;  %s1144_s30 = scalar_lea.vmem %s1226_s27, 256 }
  0x2e   : > { %p1141_p13 = scmp.ne.s32.totalorder %s1134_s24, %s1140_s25  ;;  %p1146_p3 = scmp.lt.s32.totalorder %s1144_s30, %s1140_s25 }
  0x30   : > { %p1142_p0 = pnand %p1141_p13, %p1337_p1 }
  0x32   : > { %p1143_p2 = pneg %p1142_p0 }
  0x34   : > { %p1148_p9 = pnand %p1146_p3, %p1143_p2 }
  0x36   : > { %1151 = shalt.err (!%p1148_p9)
}
  0x37   : > { %s1227_s9 = smov 128   ;;  %s1228_s11 = smov 8  }
  0x38   : > { %213 = dma.hbm_to_vmem [thread:$0]  (%p1337_p1), %s1348_s7, %s962_s8, %s208_s6, %s1334_s16, %s1227_s9, %s1227_s9, %s1228_s11  }
  0x39 PF: > { %219 = sbr.rel (%p1315_p10) target bundleno = 1324 (0x52c), region = 40  ;;  %s221_s10 = sand.u32 (!%p1315_p10), 1, %s1215_s19  }
  0x3a   : > { %s964_s21 = sshll.u32 (!%p1315_p10), %s221_s10, 7  ;;  %s222_s13 = scalar_lea.sflag (!%p1315_p10), [#allocation6], %s221_s10 }
  0x3b   : > { %s1377_s14 = scalar_lea.vmem (!%p1315_p10), [#allocation5], %s964_s21 }
  0x3e   : > { %1198 = dma.done.wait (%p1310_p8), %s222_s13, 2048  }
  0x3f   : > { %1200 = vsyncadd (%p1310_p8), %s222_s13, 4294965248 }
  0x40   : > { %1202 = dma.done.wait (%p41_p5), [#allocation8], 16  }
  0x41   : > { %1204 = vsyncadd (%p41_p5), [#allocation8], 4294967280 }
  0x42   : > { %236 = sfence }
  0x43   : > { %p1541_p9 = scmp.ne.s32.totalorder %s1286_s22, 0 }
  0x45   : > { %262 = sbr.rel (%p1541_p9) target bundleno = 83 (0x53), region = 52 }
  0x4a   : > { %vm263_vm0 = vcmask 7168   ;;  %v1229_v0 = vmov 0.0  }
  0x4b   : > { %264 = vst.msk [vmem:[#allocation3] sm:$0xff] %vm263_vm0, %v1229_v0 }
  0x4c   : > { %265 = vst.msk [vmem:[#allocation3 + $0x8] sm:$0xff] %vm263_vm0, %v1229_v0 }
  0x4d   : > { %266 = vst.msk [vmem:[#allocation3 + $0x10] sm:$0xff] %vm263_vm0, %v1229_v0 }
  0x4e   : > { %267 = vst.msk [vmem:[#allocation3 + $0x18] sm:$0xff] %vm263_vm0, %v1229_v0 }
  0x4f   : > { %268 = vst.msk [vmem:[#allocation4] sm:$0xff] %vm263_vm0, %v1229_v0 }
  0x50   : > { %269 = vst.msk [vmem:[#allocation4 + $0x8] sm:$0xff] %vm263_vm0, %v1229_v0 }
  0x51   : > { %270 = vst.msk [vmem:[#allocation4 + $0x10] sm:$0xff] %vm263_vm0, %v1229_v0 }
  0x52   : > { %271 = vst.msk [vmem:[#allocation4 + $0x18] sm:$0xff] %vm263_vm0, %v1229_v0 }
  0x53 PF: > { %v290_v1 = vld [vmem:[%s1377_s14 + $0x70] sm:$0xff]  ;;  %v291_v2 = vld [vmem:[%s1377_s14 + $0x78] sm:$0xff]  ;;  %v288_v4 = vld [vmem:[%s1377_s14 + $0x60] sm:$0xff]  ;;  %v1230_v20 = vmov 0   ;;  %s975_s27 = sshll.u32 %s1286_s22, 7  ;;  %v357_v32 = vlaneseq  ;;  %vm383_vm2 = vcmask 7168  }
  0x54   : > { %v299_v3 = vpack.c.bf16 %v291_v2, %v290_v1  ;;  %v289_v5 = vld [vmem:[%s1377_s14 + $0x68] sm:$0xff]  ;;  %v286_v7 = vld [vmem:[%s1377_s14 + $0x50] sm:$0xff]  ;;  %v287_v8 = vld [vmem:[%s1377_s14 + $0x58] sm:$0xff]  ;;  %1070 = vset.pattern.permute.xlu0 %v1230_v20  ;;  %1071 = vset.pattern.permute.xlu1 %v1230_v20  ;;  %s356_s30 = ssub.s32 300, %s975_s27  ;;  %s416_s9 = sshra.s32 %s975_s27, 7 }
  0x55   : > { %v298_v6 = vpack.c.bf16 %v289_v5, %v288_v4  ;;  %v297_v9 = vpack.c.bf16 %v287_v8, %v286_v7  ;;  %v284_v10 = vld [vmem:[%s1377_s14 + $0x40] sm:$0xff]  ;;  %v285_v11 = vld [vmem:[%s1377_s14 + $0x48] sm:$0xff]  ;;  %v282_v13 = vld [vmem:[%s1377_s14 + $0x30] sm:$0xff]  ;;  %v1425_v33 = vand.u32 127, %v357_v32  ;;  %v359_v36 = vstv %s356_s30  ;;  %s976_s11 = sshll.u32 %s416_s9, 2  ;;  %p977_p5 = scmp.ne.s32.totalorder %s1286_s22, 2 }
  0x56   : > { %336 = vmatpush.bf16.xpose.msra.mxu0 %v299_v3  ;;  %990 = vmatpush.bf16.xpose.msra.mxu1 %v299_v3  ;;  %v296_v12 = vpack.c.bf16 %v285_v11, %v284_v10  ;;  %v283_v14 = vld [vmem:[%s1377_s14 + $0x38] sm:$0xff]  ;;  %v272_v16 = vld [vmem:[%s1533_s2] sm:$0xff]  ;;  %v274_v17 = vld [vmem:[%s1533_s2 + $0x10] sm:$0xff]  ;;  %s419_s10 = scalar_lea.vmem [#allocation2], %s976_s11  ;;  %s1231_s21 = smov (!%p977_p5), 1  }
  0x57   : > { %v295_v15 = vpack.c.bf16 %v283_v14, %v282_v13  ;;  %v280_v18 = vld [vmem:[%s1377_s14 + $0x20] sm:$0xff]  ;;  %v281_v19 = vld [vmem:[%s1377_s14 + $0x28] sm:$0xff]  ;;  %306 = vperm.xlu0 %1070, %v272_v16   ;;  %316 = vperm.xlu1 %1071, %v274_v17   ;;  %v273_v22 = vld [vmem:[%s1533_s2 + $0x8] sm:$0xff]  ;;  %vm1428_vm1 = vcmp.lt.s32.totalorder %v1425_v33, %v359_v36  ;;  %s1232_s12 = smov (!%p977_p5), 127   ;;  %s1234_s8 = smov (!%p977_p5), 2  }
  0x58   : > { %v294_v21 = vpack.c.bf16 %v281_v19, %v280_v18  ;;  %v275_v23 = vld [vmem:[%s1533_s2 + $0x18] sm:$0xff]  ;;  %v278_v24 = vld [vmem:[%s1377_s14 + $0x10] sm:$0xff]  ;;  %v279_v25 = vld [vmem:[%s1377_s14 + $0x18] sm:$0xff]  ;;  %s432_s9 = sld [smem:[#allocation9]] (!%p977_p5) }
  0x59   : > { %v293_v26 = vpack.c.bf16 %v279_v25, %v278_v24  ;;  %v276_v27 = vld [vmem:[%s1377_s14] sm:$0xff]  ;;  %v277_v28 = vld [vmem:[%s1377_s14 + $0x8] sm:$0xff]  ;;  %v988_v30 = vld [vmem:[%s1532_s1] sm:$0xff]  ;;  %s981_s29 = sld [smem:[#allocation9 + $0x1]] (!%p977_p5) }
  0x5a   : > { %v292_v29 = vpack.c.bf16 %v277_v28, %v276_v27  ;;  %v989_v31 = vld [vmem:[%s1532_s1 + $0x8] sm:$0xff]  ;;  %v367_v60 = vld [vmem:[#allocation3] sm:$0xff]  ;;  %v369_v61 = vld [vmem:[#allocation3 + $0x10] sm:$0xff] }
  0x5b   : > { %v368_v2 = vld [vmem:[#allocation3 + $0x8] sm:$0xff]  ;;  %v370_v3 = vld [vmem:[#allocation3 + $0x18] sm:$0xff]  ;;  %v388_v8 = vld [vmem:[#allocation4] sm:$0xff] }
  0x5c   : > { %v390_v11 = vld [vmem:[#allocation4 + $0x10] sm:$0xff]  ;;  %v389_v14 = vld [vmem:[#allocation4 + $0x8] sm:$0xff]  ;;  %v391_v17 = vld [vmem:[#allocation4 + $0x18] sm:$0xff] }
  0x5e   : > { %337 = vmatpush.bf16.xpose.msra.mxu0 %v298_v6  ;;  %991 = vmatpush.bf16.xpose.msra.mxu1 %v298_v6 }
  0x5f   : > { %311 = vperm.xlu0 %1070, %v273_v22   ;;  %321 = vperm.xlu1 %1071, %v275_v23  }
  0x66   : > { %338 = vmatpush.bf16.xpose.msra.mxu0 %v297_v9  ;;  %992 = vmatpush.bf16.xpose.msra.mxu1 %v297_v9 }
  0x6e   : > { %339 = vmatpush.bf16.xpose.msra.mxu0 %v296_v12  ;;  %993 = vmatpush.bf16.xpose.msra.mxu1 %v296_v12 }
  0x76   : > { %340 = vmatpush.bf16.xpose.msra.mxu0 %v295_v15  ;;  %994 = vmatpush.bf16.xpose.msra.mxu1 %v295_v15 }
  0x7e   : > { %341 = vmatpush.bf16.xpose.msra.mxu0 %v294_v21  ;;  %995 = vmatpush.bf16.xpose.msra.mxu1 %v294_v21 }
  0x86   : > { %342 = vmatpush.bf16.xpose.msra.mxu0 %v293_v26  ;;  %996 = vmatpush.bf16.xpose.msra.mxu1 %v293_v26 }
  0x8e   : > { %343 = vmatpush.bf16.xpose.msra.mxu0 %v292_v29  ;;  %997 = vmatpush.bf16.xpose.msra.mxu1 %v292_v29 }
  0x95   : > { %344 = vmatmul.bf16.vlgmr.msra.gmra.mxu0 %v988_v30  ;;  %349 = vmatmul.bf16.vlgmr.msra.gmra.mxu1 %v989_v31 }
  0xc9   : > { %v317_v34 = vpop.permute.xlu1 %316  ;;  %v307_v35 = vpop.permute.xlu0 %306 }
  0xd1   : > { %v322_v46 = vpop.permute.xlu1 %321  ;;  %v312_v47 = vpop.permute.xlu0 %311 }
 0x112   : > { %v345_v37 = vpop.f32.mrf.mxu0  ;;  %v350_v39 = vpop.f32.mrf.mxu1 }
 0x113   : > { %v346_v40 = vadd.f32 %v345_v37, %v307_v35  ;;  %v351_v41 = vadd.f32 %v350_v39, %v317_v34 }
 0x115   : > { %v412_v42 = vpack.c.bf16 %v346_v40, %v346_v40  ;;  %v363_v43 = vsel %vm1428_vm1, %v346_v40, 0.0  ;;  %v414_v44 = vpack.c.bf16 %v351_v41, %v351_v41  ;;  %v365_v45 = vsel %vm1428_vm1, %v351_v41, 0.0 }
 0x116   : > { %371 = vadd.xlane.f32.xlu2 %v363_v43  ;;  %375 = vadd.xlane.f32.xlu0 %v365_v45  ;;  %v392_v56 = vmul.f32 %v363_v43, %v363_v43  ;;  %v394_v57 = vmul.f32 %v365_v45, %v365_v45 }
 0x117   : > { %420 = vst [vmem:[%s419_s10] sm:$0xf] %v412_v42 }
 0x118   : > { %422 = vst [vmem:[%s419_s10 + $0x18] sm:$0xf] %v414_v44 }
 0x11a   : > { %v347_v48 = vpop.f32.mrf.mxu0  ;;  %v352_v49 = vpop.f32.mrf.mxu1 }
 0x11b   : > { %v348_v50 = vadd.f32 %v347_v48, %v312_v47  ;;  %v353_v51 = vadd.f32 %v352_v49, %v322_v46 }
 0x11d   : > { %v413_v52 = vpack.c.bf16 %v348_v50, %v348_v50  ;;  %v364_v53 = vsel %vm1428_vm1, %v348_v50, 0.0  ;;  %v415_v54 = vpack.c.bf16 %v353_v51, %v353_v51  ;;  %v366_v55 = vsel %vm1428_vm1, %v353_v51, 0.0 }
 0x11e   : > { %373 = vadd.xlane.f32.xlu2 %v364_v53  ;;  %377 = vadd.xlane.f32.xlu1 %v366_v55  ;;  %v393_v58 = vmul.f32 %v364_v53, %v364_v53  ;;  %v395_v59 = vmul.f32 %v366_v55, %v366_v55 }
 0x11f   : > { %421 = vst [vmem:[%s419_s10 + $0xc] sm:$0xf] %v413_v52 }
 0x120   : > { %423 = vst [vmem:[%s419_s10 + $0x24] sm:$0xf] %v415_v54 }
 0x126   : > { %396 = vadd.xlane.f32.xlu2 %v392_v56 }
 0x12e   : > { %400 = vadd.xlane.f32.xlu2 %v394_v57 }
 0x136   : > { %398 = vadd.xlane.f32.xlu2 %v393_v58 }
 0x13e   : > { %402 = vadd.xlane.f32.xlu2 %v395_v59 }
 0x189   : > { %v372_v62 = vpop.xlane.xlu2 %371  ;;  %v376_v63 = vpop.xlane.xlu0 %375 }
 0x18a   : > { %v379_v0 = vadd.f32 %v372_v62, %v367_v60  ;;  %v381_v1 = vadd.f32 %v376_v63, %v369_v61 }
 0x18c   : > { %384 = vst.msk [vmem:[#allocation3] sm:$0xff] %vm383_vm2, %v379_v0 }
 0x18d   : > { %386 = vst.msk [vmem:[#allocation3 + $0x10] sm:$0xff] %vm383_vm2, %v381_v1 }
 0x191   : > { %v374_v4 = vpop.xlane.xlu2 %373  ;;  %v378_v5 = vpop.xlane.xlu1 %377 }
 0x192   : > { %v380_v6 = vadd.f32 %v374_v4, %v368_v2  ;;  %v382_v7 = vadd.f32 %v378_v5, %v370_v3 }
 0x194   : > { %385 = vst.msk [vmem:[#allocation3 + $0x8] sm:$0xff] %vm383_vm2, %v380_v6 }
 0x195   : > { %387 = vst.msk [vmem:[#allocation3 + $0x18] sm:$0xff] %vm383_vm2, %v382_v7 }
 0x199   : > { %v397_v9 = vpop.xlane.xlu2 %396 }
 0x19a   : > { %v404_v10 = vadd.f32 %v397_v9, %v388_v8 }
 0x19c   : > { %408 = vst.msk [vmem:[#allocation4] sm:$0xff] %vm383_vm2, %v404_v10 }
 0x1a1   : > { %v401_v12 = vpop.xlane.xlu2 %400 }
 0x1a2   : > { %v406_v13 = vadd.f32 %v401_v12, %v390_v11 }
 0x1a4   : > { %410 = vst.msk [vmem:[#allocation4 + $0x10] sm:$0xff] %vm383_vm2, %v406_v13 }
 0x1a9   : > { %v399_v15 = vpop.xlane.xlu2 %398 }
 0x1aa   : > { %v405_v16 = vadd.f32 %v399_v15, %v389_v14 }
 0x1ac   : > { %409 = vst.msk [vmem:[#allocation4 + $0x8] sm:$0xff] %vm383_vm2, %v405_v16 }
 0x1b0   : > { %427 = sbr.rel (%p977_p5) target bundleno = 1319 (0x527), region = 56 }
 0x1b1   : > { %v403_v18 = vpop.xlane.xlu2 %402 }
 0x1b2   : > { %v407_v19 = vadd.f32 %v403_v18, %v391_v17 }
 0x1b4   : > { %411 = vst.msk [vmem:[#allocation4 + $0x18] sm:$0xff] %vm383_vm2, %v407_v19 }
 0x1b5   : > { %v436_v20 = vld [vmem:[#allocation3 + $0x18] sm:$0xff]  ;;  %v434_v22 = vld [vmem:[#allocation3 + $0x8] sm:$0xff]  ;;  %v435_v27 = vld [vmem:[#allocation3 + $0x10] sm:$0xff]  ;;  %vm619_vm15 = vcmask 261120   ;;  %vm1491_vm0 = vcmp.lt.s32.totalorder %v357_v32, 128  ;;  %vm652_vm1 = vcmask 1040384  }
 0x1b6   : > { %v1449_v23 = vmul.f32 0.0033333334, %v436_v20  ;;  %v1451_v25 = vmul.f32 0.0033333334, %v434_v22  ;;  %v442_v26 = vld [vmem:[#allocation4 + $0x8] sm:$0xff]  ;;  %v443_v28 = vld [vmem:[#allocation4 + $0x10] sm:$0xff] }
 0x1b7   : > { %v446_v30 = vmul.f32 0.0033333334, %v442_v26  ;;  %v1457_v34 = vmul.f32 0.0033333334, %v435_v27  ;;  %v433_v35 = vld [vmem:[#allocation3] sm:$0xff]  ;;  %v431_v14 = vld [vmem:[%s1533_s2 + $0x18] sm:$0xff] }
 0x1b8   : > { %v452_v29 = vmul.f32 %v1449_v23, %v1449_v23  ;;  %v450_v31 = vmul.f32 %v1451_v25, %v1451_v25  ;;  %v441_v36 = vld [vmem:[#allocation4] sm:$0xff]  ;;  %v447_v37 = vmul.f32 0.0033333334, %v443_v28  ;;  %v1459_v38 = vmul.f32 0.0033333334, %v433_v35  ;;  %v429_v15 = vld [vmem:[%s1533_s2 + $0x8] sm:$0xff] }
 0x1b9   : > { %v445_v39 = vmul.f32 0.0033333334, %v441_v36  ;;  %v451_v42 = vmul.f32 %v1457_v34, %v1457_v34  ;;  %v430_v20 = vld [vmem:[%s1533_s2 + $0x10] sm:$0xff]  ;;  %v1233_v28 = vmov 1  }
 0x1ba   : > { %v454_v41 = vsub.f32 %v446_v30, %v450_v31  ;;  %v449_v43 = vmul.f32 %v1459_v38, %v1459_v38  ;;  %1072 = vset.pattern.permute.xlu0 %v1233_v28  ;;  %1073 = vset.pattern.permute.xlu1 %v1233_v28 }
 0x1bb   : > { %v444_v21 = vld [vmem:[#allocation4 + $0x18] sm:$0xff]  ;;  %v455_v46 = vsub.f32 %v447_v37, %v451_v42 }
 0x1bc   : > { %v448_v24 = vmul.f32 0.0033333334, %v444_v21  ;;  %v458_v45 = vadd.f32 1e-05, %v454_v41  ;;  %v453_v47 = vsub.f32 %v445_v39, %v449_v43  ;;  %v428_v21 = vld [vmem:[%s1533_s2] sm:$0xff]  ;;  %v1235_v41 = vmov 2  }
 0x1bd   : > { %v459_v48 = vadd.f32 1e-05, %v455_v46  ;;  %1074 = vset.pattern.permute.xlu2 %v1235_v41 }
 0x1be   : > { %v456_v40 = vsub.f32 %v448_v24, %v452_v29  ;;  %v457_v49 = vadd.f32 1e-05, %v453_v47  ;;  %vm477_vm5 = vweird.f32 %v458_v45  ;;  %v682_v47 = vld [vmem:[#allocation2 + $0x28] sm:$0xff]  }
 0x1bf   : > { %vm487_vm9 = vweird.f32 %v459_v48 }
 0x1c0   : > { %v460_v44 = vadd.f32 1e-05, %v456_v40  ;;  %vm467_vm11 = vweird.f32 %v457_v49 }
 0x1c2   : > { %1077 = vrsqrt.f32 %v460_v44  ;;  %vm497_vm3 = vweird.f32 %v460_v44 }
 0x1c3   : > { %1079 = vrsqrt.f32 %v458_v45 }
 0x1c4   : > { %1081 = vrsqrt.f32 %v459_v48 }
 0x1c5   : > { %1083 = vrsqrt.f32 %v457_v49 }
 0x1c8   : > { %v1078_v50 = vpop.eup %1077 }
 0x1c9   : > { %v1080_v51 = vpop.eup %1079  ;;  %v492_v52 = vmul.f32 %v1078_v50, %v460_v44  ;;  %vm498_vm4 = vweird.f32 %v1078_v50 }
 0x1ca   : > { %v1082_v53 = vpop.eup %1081  ;;  %v472_v54 = vmul.f32 %v1080_v51, %v458_v45  ;;  %vm478_vm6 = vweird.f32 %v1080_v51  ;;  %vm499_vm7 = vmor %vm497_vm3, %vm498_vm4 }
 0x1cb   : > { %v1084_v55 = vpop.eup %1083  ;;  %v493_v56 = vmul.f32 %v1078_v50, %v492_v52  ;;  %v482_v57 = vmul.f32 %v1082_v53, %v459_v48  ;;  %vm479_vm8 = vmor %vm477_vm5, %vm478_vm6  ;;  %vm488_vm10 = vweird.f32 %v1082_v53 }
 0x1cc   : > { %v473_v58 = vmul.f32 %v1080_v51, %v472_v54  ;;  %v462_v59 = vmul.f32 %v1084_v55, %v457_v49  ;;  %vm468_vm12 = vweird.f32 %v1084_v55  ;;  %vm489_vm13 = vmor %vm487_vm9, %vm488_vm10  ;;  %v686_v49 = vunpack.c.l.bf16 %v682_v47 }
 0x1cd   : > { %v494_v60 = vmul.f32 0.5, %v493_v56  ;;  %v483_v61 = vmul.f32 %v1082_v53, %v482_v57  ;;  %vm469_vm14 = vmor %vm467_vm11, %vm468_vm12 }
 0x1ce   : > { %v474_v62 = vmul.f32 0.5, %v473_v58  ;;  %v463_v63 = vmul.f32 %v1084_v55, %v462_v59 }
 0x1cf   : > { %v495_v0 = vsub.f32 1.5, %v494_v60  ;;  %v484_v1 = vmul.f32 0.5, %v483_v61 }
 0x1d0   : > { %v475_v2 = vsub.f32 1.5, %v474_v62  ;;  %v464_v3 = vmul.f32 0.5, %v463_v63  ;;  %v563_v62 = vld [vmem:[#allocation2 + $0x18] sm:$0xff]  }
 0x1d1   : > { %v496_v4 = vmul.f32 %v1078_v50, %v495_v0  ;;  %v485_v5 = vsub.f32 1.5, %v484_v1  ;;  %v567_v63 = vunpack.c.l.bf16 %v563_v62  ;;  %v685_v0 = vunpack.c.h.bf16 %v563_v62 }
 0x1d2   : > { %v476_v6 = vmul.f32 %v1080_v51, %v475_v2  ;;  %v465_v7 = vsub.f32 1.5, %v464_v3 }
 0x1d3   : > { %v500_v8 = vsel %vm499_vm7, %v1078_v50, %v496_v4  ;;  %v486_v10 = vmul.f32 %v1082_v53, %v485_v5  ;;  %v762_v50 = vunpack.c.h.bf16 %v682_v47  ;;  %v699_v47 = vld [vmem:[%s1534_s3] sm:$0x1] }
 0x1d4   : > { %511 = vrot.lane.b32.xlu0 %v500_v8, %s1231_s21  ;;  %v480_v9 = vsel %vm479_vm8, %v1080_v51, %v476_v6  ;;  %v466_v11 = vmul.f32 %v1084_v55, %v465_v7 }
 0x1d5   : > { %507 = vrot.lane.b32.xlu1 %v480_v9, %s1231_s21  ;;  %v490_v12 = vsel %vm489_vm13, %v1082_v53, %v486_v10 }
 0x1d6   : > { %v470_v13 = vsel %vm469_vm14, %v1084_v55, %v466_v11 }
 0x1dc   : > { %509 = vrot.lane.b32.xlu0 %v490_v12, %s1231_s21 }
 0x1dd   : > { %505 = vrot.lane.b32.xlu1 %v470_v13, %s1231_s21  ;;  %v561_v13 = vld [vmem:[#allocation2] sm:$0xff]  }
 0x246   : > { %v512_v16 = vpop.permute.xlu0 %511 }
 0x247   : > { %v520_v17 = vmul.f32 %v512_v16, %v431_v14  ;;  %v508_v18 = vpop.permute.xlu1 %507  ;;  %v755_v16 = vld [vmem:[#allocation2 + $0x8] sm:$0xff]  }
 0x248   : > { %v518_v19 = vmul.f32 %v508_v18, %v429_v15  ;;  %v683_v18 = vunpack.c.h.bf16 %v561_v13 }
 0x249   : > { %531 = vrot.lane.b32.xlu2 %v520_v17, %s1232_s12 }
 0x24a   : > { %527 = vrot.lane.b32.xlu0 %v518_v19, %s1232_s12 }
 0x24e   : > { %v510_v22 = vpop.permute.xlu0 %509 }
 0x24f   : > { %v519_v24 = vmul.f32 %v510_v22, %v430_v20  ;;  %v506_v26 = vpop.permute.xlu1 %505 }
 0x250   : > { %v517_v27 = vmul.f32 %v506_v26, %v428_v21 }
 0x251   : > { %529 = vrot.lane.b32.xlu2 %v519_v24, %s1232_s12 }
 0x252   : > { %525 = vrot.lane.b32.xlu1 %v517_v27, %s1232_s12  ;;  %s982_s12 = sld [smem:[#allocation9 + $0x2]] }
 0x2a3   : > { %v532_v29 = vpop.permute.xlu2 %531 }
 0x2a4   : > { %v540_v30 = vmul.f32 %v532_v29, %v1449_v23 }
 0x2a6   : > { %551 = vrot.lane.b32.xlu2 %v540_v30, %s1234_s8 }
 0x2ab   : > { %v530_v31 = vpop.permute.xlu2 %529 }
 0x2ac   : > { %v539_v35 = vmul.f32 %v530_v31, %v1457_v34 }
 0x2ae   : > { %549 = vrot.lane.b32.xlu0 %v539_v35, %s1234_s8 }
 0x2b6   : > { %582 = vperm.xlu0 %1072, %v520_v17   ;;  %v565_v17 = vunpack.c.l.bf16 %v561_v13 }
 0x2bc   : > { %v528_v36 = vpop.permute.xlu0 %527 }
 0x2bd   : > { %v538_v37 = vmul.f32 %v528_v36, %v1451_v25 }
 0x2be   : > { %570 = vperm.xlu0 %1072, %v517_v27  }
 0x2bf   : > { %547 = vrot.lane.b32.xlu1 %v538_v37, %s1234_s8 }
 0x2c4   : > { %v526_v39 = vpop.permute.xlu1 %525 }
 0x2c5   : > { %v537_v40 = vmul.f32 %v526_v39, %v1459_v38  ;;  %v757_v38 = vld [vmem:[#allocation2 + $0x20] sm:$0xff]  }
 0x2c6   : > { %1076 = vset.pattern.permute.xlu0 %v1235_v41  ;;  %v568_v48 = vunpack.c.h.bf16 %v757_v38  ;;  %v761_v1 = vunpack.c.l.bf16 %v757_v38 }
 0x2c7   : > { %578 = vperm.xlu1 %1073, %v519_v24   ;;  %545 = vrot.lane.b32.xlu2 %v537_v40, %s1234_s8  ;;  %v759_v24 = vunpack.c.l.bf16 %v755_v16 }
 0x2cf   : > { %574 = vperm.xlu1 %1073, %v518_v19  }
 0x2d7   : > { %1075 = vset.pattern.permute.xlu1 %v1235_v41 }
 0x300   : > { %v552_v23 = vpop.permute.xlu2 %551 }
 0x301   : > { %v560_v42 = vsub.f32 %v431_v14, %v552_v23  ;;  %v680_v14 = vld [vmem:[#allocation2 + $0x10] sm:$0xff]  }
 0x302   : > { %v760_v22 = vunpack.c.h.bf16 %v680_v14 }
 0x303   : > { %606 = vperm.xlu2 %1074, %v560_v42  }
 0x320   : > { %v550_v34 = vpop.permute.xlu0 %549 }
 0x321   : > { %v559_v43 = vsub.f32 %v430_v20, %v550_v34  ;;  %v546_v44 = vpop.permute.xlu2 %545  ;;  %v566_v20 = vunpack.c.h.bf16 %v755_v16 }
 0x322   : > { %v557_v25 = vsub.f32 %v428_v21, %v546_v44  ;;  %v684_v21 = vunpack.c.l.bf16 %v680_v14 }
 0x323   : > { %601 = vperm.xlu2 %1074, %v559_v43  }
 0x328   : > { %v583_v51 = vpop.permute.xlu0 %582 }
 0x329   : > { %v588_v52 = vmul.f32 %v583_v51, %v568_v48  ;;  %v690_v53 = vmul.f32 %v686_v49, %v583_v51  ;;  %v766_v54 = vmul.f32 %v762_v50, %v583_v51  ;;  %v775_v48 = vld [vmem:[%s1534_s3] sm:$0x1]  ;;  %v618_v49 = vstv %s432_s9 }
 0x32b   : > { %591 = vperm.xlu2 %1074, %v557_v25  }
 0x330   : > { %v571_v19 = vpop.permute.xlu0 %570 }
 0x331   : > { %v548_v45 = vpop.permute.xlu1 %547  ;;  %v585_v27 = vmul.f32 %v571_v19, %v565_v17  ;;  %v687_v28 = vmul.f32 %v683_v18, %v571_v19  ;;  %v763_v35 = vmul.f32 %v759_v24, %v571_v19 }
 0x332   : > { %v558_v46 = vsub.f32 %v429_v15, %v548_v45 }
 0x334   : > { %596 = vperm.xlu1 %1075, %v558_v46   ;;  %v617_v46 = vld [vmem:[%s1534_s3] sm:$0x1] }
 0x339   : > { %v579_v2 = vpop.permute.xlu1 %578 }
 0x33a   : > { %v587_v3 = vmul.f32 %v579_v2, %v567_v63  ;;  %v689_v4 = vmul.f32 %v685_v0, %v579_v2  ;;  %v765_v5 = vmul.f32 %v761_v1, %v579_v2 }
 0x341   : > { %v575_v15 = vpop.permute.xlu1 %574 }
 0x342   : > { %v586_v29 = vmul.f32 %v575_v15, %v566_v20  ;;  %v688_v30 = vmul.f32 %v684_v21, %v575_v15  ;;  %v764_v31 = vmul.f32 %v760_v22, %v575_v15 }
 0x35d   : > { %v607_v55 = vpop.permute.xlu2 %606 }
 0x35e   : > { %v612_v56 = vadd.f32 %v607_v55, %v588_v52  ;;  %v694_v57 = vadd.f32 %v690_v53, %v607_v55  ;;  %v770_v58 = vadd.f32 %v766_v54, %v607_v55 }
 0x360   : > { %v616_v59 = vmax.f32 %v612_v56, 0.0  ;;  %v698_v60 = vmax.f32 %v694_v57, 0.0  ;;  %v774_v61 = vmax.f32 %v770_v58, 0.0  ;;  %v802_v57 = vadd.s32 256, %v1425_v33 }
 0x362   : > { %635 = vmatpush.msra.mxu0 %v616_v59  ;;  %715 = vmatpush.msra.mxu1 %v698_v60  ;;  %vm803_vm2 = vcmp.lt.s32.totalorder %v802_v57, 300 }
 0x363   : > { %791 = vmatpush.msra.mxu2 %v774_v61 }
 0x37d   : > { %v602_v6 = vpop.permute.xlu2 %601 }
 0x37e   : > { %v611_v7 = vadd.f32 %v602_v6, %v587_v3  ;;  %v693_v8 = vadd.f32 %v689_v4, %v602_v6  ;;  %v769_v9 = vadd.f32 %v765_v5, %v602_v6 }
 0x380   : > { %v615_v10 = vmax.f32 %v611_v7, 0.0  ;;  %v697_v11 = vmax.f32 %v693_v8, 0.0  ;;  %v773_v12 = vmax.f32 %v769_v9, 0.0 }
 0x382   : > { %636 = vmatpush.msra.mxu0 %v615_v10  ;;  %716 = vmatpush.msra.mxu1 %v697_v11 }
 0x383   : > { %792 = vmatpush.msra.mxu2 %v773_v12 }
 0x385   : > { %v592_v26 = vpop.permute.xlu2 %591 }
 0x386   : > { %v609_v37 = vadd.f32 %v592_v26, %v585_v27  ;;  %v691_v23 = vadd.f32 %v687_v28, %v592_v26  ;;  %v767_v42 = vadd.f32 %v763_v35, %v592_v26 }
 0x388   : > { %v613_v25 = vmax.f32 %v609_v37, 0.0  ;;  %v695_v45 = vmax.f32 %v691_v23, 0.0  ;;  %v771_v38 = vmax.f32 %v767_v42, 0.0 }
 0x3a6   : > { %v597_v36 = vpop.permute.xlu1 %596 }
 0x3a7   : > { %v610_v39 = vadd.f32 %v597_v36, %v586_v29  ;;  %v692_v40 = vadd.f32 %v688_v30, %v597_v36  ;;  %v768_v41 = vadd.f32 %v764_v31, %v597_v36 }
 0x3a9   : > { %v614_v34 = vmax.f32 %v610_v39, 0.0  ;;  %v696_v43 = vmax.f32 %v692_v40, 0.0  ;;  %v772_v44 = vmax.f32 %v768_v41, 0.0 }
 0x3ab   : > { %637 = vmatpush.msra.mxu0 %v614_v34  ;;  %717 = vmatpush.msra.mxu1 %v696_v43 }
 0x3ac   : > { %793 = vmatpush.msra.mxu2 %v772_v44 }
 0x3ad   : > { %638 = vmatpush.msra.mxu0 %v613_v25  ;;  %718 = vmatpush.msra.mxu1 %v695_v45 }
 0x3ae   : > { %794 = vmatpush.msra.mxu2 %v771_v38  ;;  %978 = vmatmul.msk.f32.vlgmr.msra.gmra.mxu0 %vm619_vm15, %v617_v46 }
 0x3af   : > { %979 = vmatmul.msk.f32.vlgmr.msra.gmra.mxu1 %vm619_vm15, %v699_v47  ;;  %980 = vmatmul.msk.f32.vlgmr.msra.gmra.mxu2 %vm619_vm15, %v775_v48 }
 0x42b   : > { %v640_v50 = vpop.f32.mrf.mxu0 }
 0x42c   : > { %v641_v52 = vadd.f32 %v640_v50, %v618_v49  ;;  %v720_v53 = vpop.f32.mrf.mxu1 }
 0x42d   : > { %v721_v54 = vadd.f32 %v720_v53, %v618_v49 }
 0x42e   : > { %647 = vst.msk [vmem:[#allocation10] sm:$0x1] %vm1491_vm0, %v641_v52  ;;  %v653_v55 = vsel %vm652_vm1, %v641_v52, 0.0  ;;  %v665_v56 = vmul.f32 %v641_v52, %v641_v52 }
 0x42f   : > { %724 = vst.msk [vmem:[#allocation10 + $0x1] sm:$0x1] %vm1491_vm0, %v721_v54  ;;  %654 = vadd.xlane.f32.xlu0 %v653_v55  ;;  %v729_v32 = vsel %vm652_vm1, %v721_v54, 0.0  ;;  %v741_v61 = vmul.f32 %v721_v54, %v721_v54 }
 0x430   : > { %730 = vadd.xlane.f32.xlu2 %v729_v32  ;;  %v666_v58 = vsel %vm652_vm1, %v665_v56, 0.0 }
 0x431   : > { %667 = vadd.xlane.f32.xlu1 %v666_v58  ;;  %v742_v0 = vsel %vm652_vm1, %v741_v61, 0.0 }
 0x432   : > { %v796_v59 = vpop.f32.mrf.mxu2 }
 0x433   : > { %v797_v60 = vadd.f32 %v796_v59, %v618_v49 }
 0x435   : > { %800 = vst.msk [vmem:[#allocation10 + $0x2] sm:$0x1] %vm1491_vm0, %v797_v60  ;;  %v804_v62 = vsel %vm803_vm2, %v797_v60, 0.0 }
 0x436   : > { %v805_v33 = vsel %vm652_vm1, %v804_v62, 0.0  ;;  %v817_v63 = vmul.f32 %v804_v62, %v804_v62 }
 0x437   : > { %806 = vadd.xlane.f32.xlu0 %v805_v33 }
 0x438   : > { %743 = vadd.xlane.f32.xlu2 %v742_v0  ;;  %v818_v1 = vsel %vm652_vm1, %v817_v63, 0.0 }
 0x439   : > { %819 = vadd.xlane.f32.xlu1 %v818_v1 }
 0x4a2   : > { %v655_v2 = vpop.xlane.xlu0 %654 }
 0x4a3   : > { %v656_v3 = vrot.slane %v655_v2, 4  ;;  %v731_v4 = vpop.xlane.xlu2 %730 }
 0x4a4   : > { %v732_v5 = vrot.slane %v731_v4, 4  ;;  %v668_v6 = vpop.xlane.xlu1 %667 }
 0x4a5   : > { %v657_v7 = vadd.f32 %v656_v3, %v655_v2  ;;  %v669_v8 = vrot.slane %v668_v6, 4  ;;  %v846_v2 = vstv %s981_s29 }
 0x4a6   : > { %v733_v9 = vadd.f32 %v732_v5, %v731_v4  ;;  %v850_v5 = vstv %s982_s12 }
 0x4a7   : > { %v658_v10 = vrot.slane %v657_v7, 2  ;;  %v670_v11 = vadd.f32 %v669_v8, %v668_v6  ;;  %v861_v8 = vld [vmem:[#allocation10 + $0x1] sm:$0x1] }
 0x4a8   : > { %v734_v12 = vrot.slane %v733_v9, 2 }
 0x4a9   : > { %v671_v13 = vrot.slane %v670_v11, 2  ;;  %v659_v14 = vadd.f32 %v658_v10, %v657_v7  ;;  %v852_v7 = vld [vmem:[#allocation10] sm:$0x1] }
 0x4aa   : > { %v807_v15 = vpop.xlane.xlu0 %806  ;;  %v735_v16 = vadd.f32 %v734_v12, %v733_v9  ;;  %v870_v9 = vld [vmem:[#allocation10 + $0x2] sm:$0x1] }
 0x4ab   : > { %v808_v17 = vrot.slane %v807_v15, 4  ;;  %v744_v18 = vpop.xlane.xlu2 %743  ;;  %v660_v19 = vrot.slane %v659_v14, 1  ;;  %v672_v20 = vadd.f32 %v671_v13, %v670_v11 }
 0x4ac   : > { %v745_v21 = vrot.slane %v744_v18, 4  ;;  %v820_v22 = vpop.xlane.xlu1 %819  ;;  %v736_v24 = vrot.slane %v735_v16, 1 }
 0x4ad   : > { %v809_v26 = vadd.f32 %v808_v17, %v807_v15  ;;  %v821_v27 = vrot.slane %v820_v22, 4  ;;  %v661_v28 = vadd.f32 %v660_v19, %v659_v14  ;;  %v673_v29 = vrot.slane %v672_v20, 1 }
 0x4ae   : > { %v746_v30 = vadd.f32 %v745_v21, %v744_v18  ;;  %v737_v39 = vadd.f32 %v736_v24, %v735_v16 }
 0x4af   : > { %v810_v31 = vrot.slane %v809_v26, 2  ;;  %v822_v35 = vadd.f32 %v821_v27, %v820_v22  ;;  %998 = vpush %v661_v28  ;;  %v674_v36 = vadd.f32 %v673_v29, %v672_v20 }
 0x4b0   : > { %v747_v37 = vrot.slane %v746_v30, 2 }
 0x4b1   : > { %v811_v40 = vadd.f32 %v810_v31, %v809_v26  ;;  %v823_v41 = vrot.slane %v822_v35, 2  ;;  %1000 = vpush %v674_v36 }
 0x4b2   : > { %v748_v23 = vadd.f32 %v747_v37, %v746_v30  ;;  %1002 = vpush %v737_v39 }
 0x4b3   : > { %v824_v42 = vadd.f32 %v823_v41, %v822_v35  ;;  %v812_v34 = vrot.slane %v811_v40, 1 }
 0x4b4   : > { %v749_v43 = vrot.slane %v748_v23, 1 }
 0x4b5   : > { %v813_v44 = vadd.f32 %v812_v34, %v811_v40  ;;  %v825_v25 = vrot.slane %v824_v42, 1 }
 0x4b6   : > { %v750_v45 = vadd.f32 %v749_v43, %v748_v23 }
 0x4b7   : > { %v826_v46 = vadd.f32 %v825_v25, %v824_v42 }
 0x4b8   : > { %1004 = vpush %v750_v45 }
 0x4b9   : > { %1006 = vpush %v813_v44 }
 0x4ba   : > { %1008 = vpush %v826_v46 }
 0x4e0   : > { %s999_s11 = spop %998 }
 0x4e1   : > { %v663_v47 = vstv %s999_s11 }
 0x4e2   : > { %s1001_s10 = spop %1000 }
 0x4e3   : > { %s1003_s21 = spop %1002  ;;  %v676_v48 = vstv %s1001_s10 }
 0x4e4   : > { %v739_v38 = vstv %s1003_s21 }
 0x4e5   : > { %v740_v49 = vadd.f32 %v739_v38, %v663_v47 }
 0x4e9   : > { %s1005_s13 = spop %1004 }
 0x4ea   : > { %v752_v50 = vstv %s1005_s13  ;;  %s1007_s14 = spop %1006 }
 0x4eb   : > { %v753_v52 = vadd.f32 %v752_v50, %v676_v48  ;;  %v815_v53 = vstv %s1007_s14  ;;  %s1009_s28 = spop %1008 }
 0x4ec   : > { %v816_v54 = vadd.f32 %v815_v53, %v740_v49  ;;  %v828_v55 = vstv %s1009_s28 }
 0x4ed   : > { %v829_v56 = vadd.f32 %v828_v55, %v753_v52 }
 0x4ee   : > { %v830_v57 = vmul.f32 0.0033333334, %v816_v54 }
 0x4ef   : > { %v831_v32 = vmul.f32 0.0033333334, %v829_v56 }
 0x4f0   : > { %v832_v58 = vmul.f32 %v830_v57, %v830_v57 }
 0x4f2   : > { %v833_v59 = vsub.f32 %v831_v32, %v832_v58 }
 0x4f4   : > { %v835_v60 = vadd.f32 1e-05, %v833_v59 }
 0x4f6   : > { %1085 = vrsqrt.f32 %v835_v60  ;;  %vm842_vm4 = vweird.f32 %v835_v60 }
 0x4fc   : > { %v1086_v61 = vpop.eup %1085 }
 0x4fd   : > { %v837_v62 = vmul.f32 %v1086_v61, %v835_v60  ;;  %vm843_vm3 = vweird.f32 %v1086_v61 }
 0x4fe   : > { %vm844_vm5 = vmor %vm842_vm4, %vm843_vm3 }
 0x4ff   : > { %v838_v33 = vmul.f32 %v1086_v61, %v837_v62 }
 0x501   : > { %v839_v63 = vmul.f32 0.5, %v838_v33 }
 0x503   : > { %v840_v0 = vsub.f32 1.5, %v839_v63 }
 0x505   : > { %v841_v1 = vmul.f32 %v1086_v61, %v840_v0 }
 0x507   : > { %v845_v3 = vsel %vm844_vm5, %v1086_v61, %v841_v1 }
 0x508   : > { %v847_v4 = vmul.f32 %v846_v2, %v845_v3 }
 0x50a   : > { %v849_v6 = vmul.f32 %v847_v4, %v830_v57  ;;  %v853_v11 = vmul.f32 %v852_v7, %v847_v4  ;;  %v862_v12 = vmul.f32 %v861_v8, %v847_v4  ;;  %v871_v13 = vmul.f32 %v870_v9, %v847_v4 }
 0x50c   : > { %v851_v10 = vsub.f32 %v850_v5, %v849_v6 }
 0x50e   : > { %v854_v14 = vadd.f32 %v853_v11, %v851_v10  ;;  %v863_v15 = vadd.f32 %v862_v12, %v851_v10  ;;  %v872_v16 = vadd.f32 %v871_v13, %v851_v10 }
 0x510   : > { %v855_v17 = vsub.f32 0.0, %v854_v14  ;;  %v864_v18 = vsub.f32 0.0, %v863_v15  ;;  %v873_v19 = vsub.f32 0.0, %v872_v16 }
 0x512   : > { %v856_v20 = vmul.f32 1.442695, %v855_v17  ;;  %v865_v21 = vmul.f32 1.442695, %v864_v18  ;;  %v874_v22 = vmul.f32 1.442695, %v873_v19 }
 0x514   : > { %1087 = vpow2.f32 %v856_v20 }
 0x515   : > { %1089 = vpow2.f32 %v865_v21 }
 0x516   : > { %1091 = vpow2.f32 %v874_v22 }
 0x51a   : > { %v1088_v24 = vpop.eup %1087 }
 0x51b   : > { %v1090_v26 = vpop.eup %1089  ;;  %v858_v27 = vadd.f32 1.0, %v1088_v24 }
 0x51c   : > { %v1092_v28 = vpop.eup %1091  ;;  %v867_v29 = vadd.f32 1.0, %v1090_v26 }
 0x51d   : > { %1093 = vrcp.f32 %v858_v27  ;;  %v876_v30 = vadd.f32 1.0, %v1092_v28 }
 0x51e   : > { %1095 = vrcp.f32 %v867_v29 }
 0x51f   : > { %1097 = vrcp.f32 %v876_v30 }
 0x523   : > { %v1094_v31 = vpop.eup %1093 }
 0x524   : > { %v1096_v35 = vpop.eup %1095  ;;  %860 = vst.msk [vmem:[#allocation10] sm:$0x1] %vm1491_vm0, %v1094_v31 }
 0x525   : > { %v1098_v36 = vpop.eup %1097  ;;  %869 = vst.msk [vmem:[#allocation10 + $0x1] sm:$0x1] %vm1491_vm0, %v1096_v35 }
 0x526   : > { %878 = vst.msk [vmem:[#allocation10 + $0x2] sm:$0x1] %vm1491_vm0, %v1098_v36 }
 0x527 PF: > { %p1025_p8 = scmp.eq.s32.totalorder %s1286_s22, 2  ;;  %s1236_s16 = smov [#allocation10]  }
 0x528   : > { %s885_s18 = sshll.u32 %s1236_s16, 4  ;;  %s887_s8 = sshll.u32 %s1536_s5, 4  ;;  %s886_s18 = int_to_ptr.vmem [resolvable:$true] %s885_s18  ;;  %s888_s8 = int_to_ptr.hbm [resolvable:$true] %s887_s8 }
 0x529   : > { %1016 = dma.vmem_to_hbm [thread:$0]  (%p1025_p8), %s886_s18, 48, %s888_s8, [#allocation7]  }
 0x52a   : > { %1206 = dma.done.wait (%p1025_p8), [#allocation7], 48  }
 0x52b   : > { %1208 = vsyncadd (%p1025_p8), [#allocation7], 4294967248 }
 0x52c PF: > { %p17_p10 = scmp.ge.s32.totalorder %s1289_s23, 5   ;;  %s1546_s18 = smov %s1215_s19 }
 0x52d   : > { %s1547_s19 = smov %s1219_s20  ;;  %s1548_s20 = smov %s1299_s26 }
 0x52e   : > { %s1549_s21 = smov %s1289_s23  ;;  %19 = sbr.rel (!%p17_p10) target bundleno = 5 (0x5), region = 95 }
 0x533   :  { %901 = vsyncpa [#allocation6], 1 }
 0x534   :  { %903 = vsyncpa [#allocation6 + $0x1], 1 }
 0x535   :  { %904 = vsyncpa [#allocation7], 1 }
 0x536   :  { %906 = vsyncpa [#allocation7 + $0x1], 1 }
 0x537   :  { %907 = vsyncpa [#allocation8], 1 }
 0x538   :  { %909 = vsyncpa [#allocation8 + $0x1], 1 }

</bundles_post_ra>
